<compile_context>
chip_gen: v5e
topology: v5e:2x2
jax: 0.10.0
libtpu: 0.0.40
codegen_flags: <defaults>
</compile_context>

<pallas_src>
import jax
import jax.numpy as jnp
import numpy as np
from jax.experimental import pallas as pl
from jax.experimental.pallas import tpu as pltpu

_EPS = 1e-5  # torch.nn.LayerNorm default
_VMEM_LIMIT = 64 * 1024 * 1024


def _ln_f32(x, gamma, beta):
    """LayerNorm over the last dim, f32 math, torch-style biased variance."""
    mu = jnp.mean(x, axis=-1, keepdims=True)
    xc = x - mu
    var = jnp.mean(xc * xc, axis=-1, keepdims=True)
    return xc * jax.lax.rsqrt(var + _EPS) * gamma + beta


# --------------- fused LN(x)@wx + bx + project(mean(LN(ctx))) ----------------
def _fused_prenorm_linear_kernel(x_ref, c_ref, gx_ref, bxln_ref, gc_ref,
                                 bcln_ref, wx_ref, bwx_ref, wc_ref, bwc_ref,
                                 o_ref, cmean_ref):
    # grid = (batch, n_tile); batch dim of x/ctx/out is squeezed by BlockSpecs.
    i = pl.program_id(1)

    # Context branch once per batch element: LN -> mean over ctx seq -> matvec.
    # (mean commuted through the linear projection; exact up to rounding order)
    @pl.when(i == 0)
    def _():
        cn = _ln_f32(c_ref[...].astype(jnp.float32), gc_ref[...], bcln_ref[...])
        cm = jnp.mean(cn, axis=0, keepdims=True)               # (1, Dc), f32
        cmean_ref[...] = (
            jnp.dot(cm.astype(jnp.bfloat16), wc_ref[...],       # (1, Dout)
                    preferred_element_type=jnp.float32)
            + bwc_ref[...])

    # x branch: LN in f32, matmul inputs in bf16, f32 accumulation.
    xn = _ln_f32(x_ref[...].astype(jnp.float32), gx_ref[...], bxln_ref[...])
    y = jnp.dot(xn.astype(jnp.bfloat16), wx_ref[...],
                preferred_element_type=jnp.float32)
    o_ref[...] = (y + bwx_ref[...] + cmean_ref[...]).astype(o_ref.dtype)


def fused_prenorm_linear(x, context, gx, bx_ln, gc, bc_ln, wx, bwx, wc, bwc,
                         *, block_rows=256):
    """Whole PreNorm(+linear cross-projection fn) forward in one pallas_call."""
    B, N, D = x.shape
    Bc, M, Dc = context.shape
    assert Bc == B
    Dout = wx.shape[1]
    assert wx.shape == (D, Dout) and wc.shape == (Dc, Dout)

    # Row tile over the x sequence axis (256-512 rows fills the MXU and keeps
    # per-step VMEM bounded; whole seq if it is small).
    tn = N if N <= block_rows else block_rows
    assert tn == N or tn % 8 == 0
    nt = pl.cdiv(N, tn)

    # bf16 weights at the call boundary: one XLA cast, half the DMA bytes and
    # resident VMEM, bf16-native MXU.  LN params / biases stay f32.
    wx_bf = wx.astype(jnp.bfloat16)
    wc_bf = wc.astype(jnp.bfloat16)
    f32 = jnp.float32
    gx2 = gx.reshape(1, D).astype(f32)
    bx2 = bx_ln.reshape(1, D).astype(f32)
    gc2 = gc.reshape(1, Dc).astype(f32)
    bc2 = bc_ln.reshape(1, Dc).astype(f32)
    bwx2 = bwx.reshape(1, Dout).astype(f32)
    bwc2 = bwc.reshape(1, Dout).astype(f32)

    # Constant-index blocks: single-buffered (no point double-buffering data
    # whose block index never changes).
    def const_spec(shape):
        return pl.BlockSpec(shape, lambda b, i: (0, 0),
                            pipeline_mode=pl.Buffered(1))

    flops = (2 * B * N * D * Dout            # x projection
             + 2 * B * Dc * Dout             # ctx mat-vec (mean commuted)
             + 10 * B * (N * D + M * Dc))    # layer norms
    bytes_accessed = (x.size * x.dtype.itemsize
                      + context.size * context.dtype.itemsize
                      + wx_bf.size * 2 + wc_bf.size * 2
                      + 4 * (2 * D + 2 * Dc + 3 * Dout)
                      + B * N * Dout * x.dtype.itemsize)

    return pl.pallas_call(
        _fused_prenorm_linear_kernel,
        out_shape=jax.ShapeDtypeStruct((B, N, Dout), x.dtype),
        grid_spec=pltpu.PrefetchScalarGridSpec(
            num_scalar_prefetch=0,
            grid=(B, nt),
            in_specs=[
                pl.BlockSpec((None, tn, D), lambda b, i: (b, i, 0)),   # x
                pl.BlockSpec((None, M, Dc), lambda b, i: (b, 0, 0)),   # context
                const_spec((1, D)),        # LN gamma x
                const_spec((1, D)),        # LN beta x
                const_spec((1, Dc)),       # LN gamma ctx
                const_spec((1, Dc)),       # LN beta ctx
                const_spec((D, Dout)),     # wx (bf16)
                const_spec((1, Dout)),     # bx
                const_spec((Dc, Dout)),    # wc (bf16)
                const_spec((1, Dout)),     # bc
            ],
            out_specs=pl.BlockSpec((None, tn, Dout), lambda b, i: (b, i, 0)),
            scratch_shapes=[pltpu.VMEM((1, Dout), jnp.float32)],  # ctx mean proj
        ),
        compiler_params=pltpu.CompilerParams(
            dimension_semantics=("parallel", "arbitrary"),
            vmem_limit_bytes=_VMEM_LIMIT),
        cost_estimate=pl.CostEstimate(
            flops=flops,
            transcendentals=B * (N + M),
            bytes_accessed=bytes_accessed),
    )(x, context, gx2, bx2, gc2, bc2, wx_bf, bwx2, wc_bf, bwc2)


# --------------------- standalone LayerNorm (generic-fn fallback) ------------
def _layernorm_kernel(x_ref, g_ref, b_ref, o_ref):
    o_ref[...] = _ln_f32(x_ref[...].astype(jnp.float32),
                         g_ref[...], b_ref[...]).astype(o_ref.dtype)


def layernorm_2d(x2d, gamma, beta, *, block_rows=512):
    """LayerNorm over last dim of (rows, dim). No pad/slice HBM round-trips:
    partial last block (if any) is masked by the Pallas pipeline."""
    R, D = x2d.shape
    br = R if R <= block_rows else block_rows
    assert br == R or br % 8 == 0
    return pl.pallas_call(
        _layernorm_kernel,
        out_shape=jax.ShapeDtypeStruct((R, D), x2d.dtype),
        grid_spec=pltpu.PrefetchScalarGridSpec(
            num_scalar_prefetch=0,
            grid=(pl.cdiv(R, br),),
            in_specs=[
                pl.BlockSpec((br, D), lambda i: (i, 0)),
                pl.BlockSpec((1, D), lambda i: (0, 0),
                             pipeline_mode=pl.Buffered(1)),
                pl.BlockSpec((1, D), lambda i: (0, 0),
                             pipeline_mode=pl.Buffered(1)),
            ],
            out_specs=pl.BlockSpec((br, D), lambda i: (i, 0)),
        ),
        compiler_params=pltpu.CompilerParams(
            dimension_semantics=("parallel",),
            vmem_limit_bytes=_VMEM_LIMIT),
        cost_estimate=pl.CostEstimate(
            flops=10 * R * D,
            transcendentals=R,
            bytes_accessed=x2d.dtype.itemsize * 2 * R * D + 4 * 2 * D),
    )(x2d, gamma.reshape(1, D).astype(jnp.float32),
      beta.reshape(1, D).astype(jnp.float32))


# --------------------------------- PreNorm -----------------------------------
class PreNorm:
    """JAX/Pallas port of the PyTorch PreNorm wrapper.

    If `fn` exposes `fused_prenorm(...)` (like `CrossProject` below), the
    LayerNorm(s) are fused with fn's matmuls inside ONE pallas_call.
    Otherwise the standalone Pallas LayerNorm kernel is applied and `fn` is
    called on the normalized tensors (exactly the PyTorch module's dataflow).
    """

    def __init__(self, dim, fn, context_dim=None, *, fuse=True):
        self.fn = fn
        self.dim = dim
        self.context_dim = context_dim
        self.fuse = fuse
        # nn.LayerNorm init: weight=1, bias=0 (deterministic, like torch)
        self.norm_g = jnp.ones((dim,), jnp.float32)
        self.norm_b = jnp.zeros((dim,), jnp.float32)
        if context_dim is not None:
            self.norm_ctx_g = jnp.ones((context_dim,), jnp.float32)
            self.norm_ctx_b = jnp.zeros((context_dim,), jnp.float32)
        else:
            self.norm_ctx_g = None
            self.norm_ctx_b = None

    def __call__(self, x, **kwargs):
        can_fuse = (self.fuse and hasattr(self.fn, "fused_prenorm")
                    and self.context_dim is not None and "context" in kwargs)
        if can_fuse:
            return self.fn.fused_prenorm(
                x, self.norm_g, self.norm_b,
                self.norm_ctx_g, self.norm_ctx_b, context=kwargs["context"])

        # TODO(synk): an arbitrary `fn` (e.g. full cross-attention) cannot be
        # fused generically; only the LayerNorms run in Pallas on this path.
        B, N, D = x.shape
        xn = layernorm_2d(x.reshape(B * N, D),
                          self.norm_g, self.norm_b).reshape(B, N, D)
        if self.norm_ctx_g is not None:
            context = kwargs["context"]
            Bc, M, Dc = context.shape
            kwargs = dict(kwargs)
            kwargs["context"] = layernorm_2d(
                context.reshape(Bc * M, Dc), self.norm_ctx_g,
                self.norm_ctx_b).reshape(Bc, M, Dc)
        return self.fn(xn, **kwargs)


# ------------- example `fn`: linear cross-projection (fusable) ---------------
class CrossProject:
    """Example fn: y = x @ wx + bx + mean_seq(ctx @ wc + bc)."""

    def __init__(self, dim, context_dim, key):
        k1, k2, k3, k4 = jax.random.split(key, 4)
        self.wx = jax.random.normal(k1, (dim, dim), jnp.float32) * 0.02
        self.bx = jax.random.normal(k2, (dim,), jnp.float32) * 0.02
        self.wc = jax.random.normal(k3, (context_dim, dim), jnp.float32) * 0.02
        self.bc = jax.random.normal(k4, (dim,), jnp.float32) * 0.02

    def fused_prenorm(self, x, gx, bx_ln, gc, bc_ln, *, context):
        return fused_prenorm_linear(x, context, gx, bx_ln, gc, bc_ln,
                                    self.wx, self.bx, self.wc, self.bc)

    def __call__(self, x, *, context=None):
        # Plain-JAX application on already-normalized inputs (generic path).
        y = x @ self.wx + self.bx
        if context is not None:
            c = context @ self.wc + self.bc
            y = y + jnp.mean(c, axis=1, keepdims=True)
        return y


# ----------------------------------- main ------------------------------------
if __name__ == "__main__":
    key = jax.random.PRNGKey(0)
    kx, kc, kfn = jax.random.split(key, 3)

    # Small, lane-dense shapes (last dims multiples of 128); N large enough to
    # exercise the N-tile grid axis (nt = 2 with the default 256-row tile).
    B, N, D = 2, 512, 128        # x:       (batch, seq, dim)
    M, Dc = 16, 256              # context: (batch, ctx_seq, context_dim)

    x = jax.random.normal(kx, (B, N, D), jnp.float32)
    context = jax.random.normal(kc, (B, M, Dc), jnp.float32)

    fn = CrossProject(D, Dc, kfn)
    prenorm = PreNorm(D, fn, context_dim=Dc)                      # fused path
    prenorm_unfused = PreNorm(D, fn, context_dim=Dc, fuse=False)  # LN-kernel path

    out = jax.block_until_ready(prenorm(x, context=context))
    out_unfused = jax.block_until_ready(prenorm_unfused(x, context=context))

    # pure-JAX f32 reference
    def ln_ref(v, g, b):
        mu = jnp.mean(v, axis=-1, keepdims=True)
        var = jnp.mean((v - mu) ** 2, axis=-1, keepdims=True)
        return (v - mu) * jax.lax.rsqrt(var + _EPS) * g + b

    xr = ln_ref(x, prenorm.norm_g, prenorm.norm_b)
    cr = ln_ref(context, prenorm.norm_ctx_g, prenorm.norm_ctx_b)
    ref = (xr @ fn.wx + fn.bx) + jnp.mean(cr @ fn.wc + fn.bc, axis=1,
                                          keepdims=True)

    # fused path uses bf16 matmul inputs (f32 accumulate) -> looser tolerance
    np.testing.assert_allclose(np.asarray(out), np.asarray(ref),
                               atol=1e-2, rtol=1e-2)
    # unfused path is f32 throughout -> tight tolerance
    np.testing.assert_allclose(np.asarray(out_unfused), np.asarray(ref),
                               atol=1e-4, rtol=1e-4)

    print("KERNEL_OK")
</pallas_src>

<mosaic_0001>
module attributes {stable_mosaic.version = 11 : i64} {
  func.func @_fused_prenorm_linear_kernel(%arg0: i32, %arg1: i32, %arg2: memref<1x256x128xf32, #tpu.memory_space<vmem>>, %arg3: memref<1x16x256xf32, #tpu.memory_space<vmem>>, %arg4: memref<1x128xf32, #tpu.memory_space<vmem>>, %arg5: memref<1x128xf32, #tpu.memory_space<vmem>>, %arg6: memref<1x256xf32, #tpu.memory_space<vmem>>, %arg7: memref<1x256xf32, #tpu.memory_space<vmem>>, %arg8: memref<128x128xbf16, #tpu.memory_space<vmem>>, %arg9: memref<1x128xf32, #tpu.memory_space<vmem>>, %arg10: memref<256x128xbf16, #tpu.memory_space<vmem>>, %arg11: memref<1x128xf32, #tpu.memory_space<vmem>>, %arg12: memref<1x256x128xf32, #tpu.memory_space<vmem>>, %arg13: memref<1x128xf32, #tpu.memory_space<vmem>>) attributes {dimension_semantics = [#tpu.dimension_semantics<parallel>, #tpu.dimension_semantics<arbitrary>], iteration_bounds = array<i64: 2, 2>, scalar_prefetch = 0 : i64, scratch_operands = 1 : i64, tpu.core_type = #tpu.core_type<tc>, window_params = [{transform_indices = @transform_0, window_bounds = array<i64: 1, 256, 128>}, {transform_indices = @transform_1, window_bounds = array<i64: 1, 16, 256>}, {pipeline_mode = #tpu.pipeline_mode<synchronous>, transform_indices = @transform_2, window_bounds = array<i64: 1, 128>}, {pipeline_mode = #tpu.pipeline_mode<synchronous>, transform_indices = @transform_3, window_bounds = array<i64: 1, 128>}, {pipeline_mode = #tpu.pipeline_mode<synchronous>, transform_indices = @transform_4, window_bounds = array<i64: 1, 256>}, {pipeline_mode = #tpu.pipeline_mode<synchronous>, transform_indices = @transform_5, window_bounds = array<i64: 1, 256>}, {pipeline_mode = #tpu.pipeline_mode<synchronous>, transform_indices = @transform_6, window_bounds = array<i64: 128, 128>}, {pipeline_mode = #tpu.pipeline_mode<synchronous>, transform_indices = @transform_7, window_bounds = array<i64: 1, 128>}, {pipeline_mode = #tpu.pipeline_mode<synchronous>, transform_indices = @transform_8, window_bounds = array<i64: 256, 128>}, {pipeline_mode = #tpu.pipeline_mode<synchronous>, transform_indices = @transform_9, window_bounds = array<i64: 1, 128>}, {transform_indices = @transform_10, window_bounds = array<i64: 1, 256, 128>}]} {
    %c0_i32 = arith.constant 0 : i32
    %0 = arith.cmpi eq, %arg1, %c0_i32 : i32
    %1 = arith.extui %0 : i1 to i32
    %c0_i32_0 = arith.constant 0 : i32
    %2 = arith.cmpi ne, %1, %c0_i32_0 : i32
    scf.if %2 {
      %c0_21 = arith.constant 0 : index
      %c0_22 = arith.constant 0 : index
      %c0_23 = arith.constant 0 : index
      %39 = vector.load %arg3[%c0_21, %c0_22, %c0_23] : memref<1x16x256xf32, #tpu.memory_space<vmem>>, vector<1x16x256xf32>
      %40 = vector.shape_cast %39 : vector<1x16x256xf32> to vector<16x256xf32>
      %c0_24 = arith.constant 0 : index
      %c0_25 = arith.constant 0 : index
      %41 = vector.load %arg6[%c0_24, %c0_25] : memref<1x256xf32, #tpu.memory_space<vmem>>, vector<1x256xf32>
      %c0_26 = arith.constant 0 : index
      %c0_27 = arith.constant 0 : index
      %42 = vector.load %arg7[%c0_26, %c0_27] : memref<1x256xf32, #tpu.memory_space<vmem>>, vector<1x256xf32>
      %cst_28 = arith.constant dense<0.000000e+00> : vector<16xf32>
      %43 = vector.multi_reduction <add>, %40, %cst_28 [1] : vector<16x256xf32> to vector<16xf32>
      %44 = vector.shape_cast %43 : vector<16xf32> to vector<16x1xf32>
      %cst_29 = arith.constant 2.560000e+02 : f32
      %45 = vector.broadcast %cst_29 : f32 to vector<16x1xf32>
      %46 = arith.divf %44, %45 : vector<16x1xf32>
      %47 = vector.broadcast %46 : vector<16x1xf32> to vector<16x256xf32>
      %48 = arith.subf %40, %47 : vector<16x256xf32>
      %49 = arith.mulf %48, %48 : vector<16x256xf32>
      %cst_30 = arith.constant dense<0.000000e+00> : vector<16xf32>
      %50 = vector.multi_reduction <add>, %49, %cst_30 [1] : vector<16x256xf32> to vector<16xf32>
      %51 = vector.shape_cast %50 : vector<16xf32> to vector<16x1xf32>
      %cst_31 = arith.constant 2.560000e+02 : f32
      %52 = vector.broadcast %cst_31 : f32 to vector<16x1xf32>
      %53 = arith.divf %51, %52 : vector<16x1xf32>
      %cst_32 = arith.constant 9.99999974E-6 : f32
      %54 = vector.broadcast %cst_32 : f32 to vector<16x1xf32>
      %55 = arith.addf %53, %54 : vector<16x1xf32>
      %56 = math.rsqrt %55 : vector<16x1xf32>
      %57 = vector.broadcast %56 : vector<16x1xf32> to vector<16x256xf32>
      %58 = arith.mulf %48, %57 : vector<16x256xf32>
      %59 = vector.broadcast %41 : vector<1x256xf32> to vector<16x256xf32>
      %60 = arith.mulf %58, %59 : vector<16x256xf32>
      %61 = vector.broadcast %42 : vector<1x256xf32> to vector<16x256xf32>
      %62 = arith.addf %60, %61 : vector<16x256xf32>
      %cst_33 = arith.constant dense<0.000000e+00> : vector<256xf32>
      %63 = vector.multi_reduction <add>, %62, %cst_33 [0] : vector<16x256xf32> to vector<256xf32>
      %64 = vector.shape_cast %63 : vector<256xf32> to vector<1x256xf32>
      %cst_34 = arith.constant 1.600000e+01 : f32
      %65 = vector.broadcast %cst_34 : f32 to vector<1x256xf32>
      %66 = arith.divf %64, %65 : vector<1x256xf32>
      %67 = arith.truncf %66 : vector<1x256xf32> to vector<1x256xbf16>
      %c0_35 = arith.constant 0 : index
      %c0_36 = arith.constant 0 : index
      %68 = vector.load %arg10[%c0_35, %c0_36] : memref<256x128xbf16, #tpu.memory_space<vmem>>, vector<256x128xbf16>
      %cst_37 = arith.constant dense<0.000000e+00> : vector<1x128xf32>
      %69 = tpu.matmul %67, %68, %cst_37 {dimension_numbers = #tpu.dot_dimension_numbers<[1], [0], [0], [1], [0, 0, 1, 1], [], []>} : vector<1x256xbf16>, vector<256x128xbf16>, vector<1x128xf32> -> vector<1x128xf32>
      %c0_38 = arith.constant 0 : index
      %c0_39 = arith.constant 0 : index
      %70 = vector.load %arg11[%c0_38, %c0_39] : memref<1x128xf32, #tpu.memory_space<vmem>>, vector<1x128xf32>
      %71 = arith.addf %69, %70 : vector<1x128xf32>
      %c0_40 = arith.constant 0 : index
      %c0_41 = arith.constant 0 : index
      %72 = vector.load %arg13[%c0_40, %c0_41] : memref<1x128xf32, #tpu.memory_space<vmem>>, vector<1x128xf32>
      tpu.vector_store %arg13[%c0_40, %c0_41], %71 {strides = array<i32>} : memref<1x128xf32, #tpu.memory_space<vmem>>, vector<1x128xf32>,
    } else {
    }
    %c0 = arith.constant 0 : index
    %c0_1 = arith.constant 0 : index
    %c0_2 = arith.constant 0 : index
    %3 = vector.load %arg2[%c0, %c0_1, %c0_2] : memref<1x256x128xf32, #tpu.memory_space<vmem>>, vector<1x256x128xf32>
    %4 = vector.shape_cast %3 : vector<1x256x128xf32> to vector<256x128xf32>
    %c0_3 = arith.constant 0 : index
    %c0_4 = arith.constant 0 : index
    %5 = vector.load %arg4[%c0_3, %c0_4] : memref<1x128xf32, #tpu.memory_space<vmem>>, vector<1x128xf32>
    %c0_5 = arith.constant 0 : index
    %c0_6 = arith.constant 0 : index
    %6 = vector.load %arg5[%c0_5, %c0_6] : memref<1x128xf32, #tpu.memory_space<vmem>>, vector<1x128xf32>
    %cst = arith.constant dense<0.000000e+00> : vector<256xf32>
    %7 = vector.multi_reduction <add>, %4, %cst [1] : vector<256x128xf32> to vector<256xf32>
    %8 = vector.shape_cast %7 : vector<256xf32> to vector<256x1xf32>
    %cst_7 = arith.constant 1.280000e+02 : f32
    %9 = vector.broadcast %cst_7 : f32 to vector<256x1xf32>
    %10 = arith.divf %8, %9 : vector<256x1xf32>
    %11 = vector.broadcast %10 : vector<256x1xf32> to vector<256x128xf32>
    %12 = arith.subf %4, %11 : vector<256x128xf32>
    %13 = arith.mulf %12, %12 : vector<256x128xf32>
    %cst_8 = arith.constant dense<0.000000e+00> : vector<256xf32>
    %14 = vector.multi_reduction <add>, %13, %cst_8 [1] : vector<256x128xf32> to vector<256xf32>
    %15 = vector.shape_cast %14 : vector<256xf32> to vector<256x1xf32>
    %cst_9 = arith.constant 1.280000e+02 : f32
    %16 = vector.broadcast %cst_9 : f32 to vector<256x1xf32>
    %17 = arith.divf %15, %16 : vector<256x1xf32>
    %cst_10 = arith.constant 9.99999974E-6 : f32
    %18 = vector.broadcast %cst_10 : f32 to vector<256x1xf32>
    %19 = arith.addf %17, %18 : vector<256x1xf32>
    %20 = math.rsqrt %19 : vector<256x1xf32>
    %21 = vector.broadcast %20 : vector<256x1xf32> to vector<256x128xf32>
    %22 = arith.mulf %12, %21 : vector<256x128xf32>
    %23 = vector.broadcast %5 : vector<1x128xf32> to vector<256x128xf32>
    %24 = arith.mulf %22, %23 : vector<256x128xf32>
    %25 = vector.broadcast %6 : vector<1x128xf32> to vector<256x128xf32>
    %26 = arith.addf %24, %25 : vector<256x128xf32>
    %27 = arith.truncf %26 : vector<256x128xf32> to vector<256x128xbf16>
    %c0_11 = arith.constant 0 : index
    %c0_12 = arith.constant 0 : index
    %28 = vector.load %arg8[%c0_11, %c0_12] : memref<128x128xbf16, #tpu.memory_space<vmem>>, vector<128x128xbf16>
    %cst_13 = arith.constant dense<0.000000e+00> : vector<256x128xf32>
    %29 = tpu.matmul %27, %28, %cst_13 {dimension_numbers = #tpu.dot_dimension_numbers<[1], [0], [0], [1], [0, 0, 1, 1], [], []>} : vector<256x128xbf16>, vector<128x128xbf16>, vector<256x128xf32> -> vector<256x128xf32>
    %c0_14 = arith.constant 0 : index
    %c0_15 = arith.constant 0 : index
    %30 = vector.load %arg9[%c0_14, %c0_15] : memref<1x128xf32, #tpu.memory_space<vmem>>, vector<1x128xf32>
    %31 = vector.broadcast %30 : vector<1x128xf32> to vector<256x128xf32>
    %32 = arith.addf %29, %31 : vector<256x128xf32>
    %c0_16 = arith.constant 0 : index
    %c0_17 = arith.constant 0 : index
    %33 = vector.load %arg13[%c0_16, %c0_17] : memref<1x128xf32, #tpu.memory_space<vmem>>, vector<1x128xf32>
    %34 = vector.broadcast %33 : vector<1x128xf32> to vector<256x128xf32>
    %35 = arith.addf %32, %34 : vector<256x128xf32>
    %c0_18 = arith.constant 0 : index
    %c0_19 = arith.constant 0 : index
    %c0_20 = arith.constant 0 : index
    %36 = vector.load %arg12[%c0_18, %c0_19, %c0_20] : memref<1x256x128xf32, #tpu.memory_space<vmem>>, vector<1x256x128xf32>
    %37 = vector.shape_cast %36 : vector<1x256x128xf32> to vector<256x128xf32>
    %38 = vector.shape_cast %35 : vector<256x128xf32> to vector<1x256x128xf32>
    tpu.vector_store %arg12[%c0_18, %c0_19, %c0_20], %38 {strides = array<i32>} : memref<1x256x128xf32, #tpu.memory_space<vmem>>, vector<1x256x128xf32>,
    return
  }
  func.func @transform_0(%arg0: i32, %arg1: i32) -> (i32, i32, i32) {
    %c0_i32 = arith.constant 0 : i32
    %c0_i32_0 = arith.constant 0 : i32
    return %arg0, %arg1, %c0_i32 : i32, i32, i32
  }
  func.func @transform_1(%arg0: i32, %arg1: i32) -> (i32, i32, i32) {
    %c0_i32 = arith.constant 0 : i32
    %c0_i32_0 = arith.constant 0 : i32
    %c0_i32_1 = arith.constant 0 : i32
    return %arg0, %c0_i32, %c0_i32_0 : i32, i32, i32
  }
  func.func @transform_2(%arg0: i32, %arg1: i32) -> (i32, i32) {
    %c0_i32 = arith.constant 0 : i32
    %c0_i32_0 = arith.constant 0 : i32
    %c0_i32_1 = arith.constant 0 : i32
    return %c0_i32, %c0_i32_0 : i32, i32
  }
  func.func @transform_3(%arg0: i32, %arg1: i32) -> (i32, i32) {
    %c0_i32 = arith.constant 0 : i32
    %c0_i32_0 = arith.constant 0 : i32
    %c0_i32_1 = arith.constant 0 : i32
    return %c0_i32, %c0_i32_0 : i32, i32
  }
  func.func @transform_4(%arg0: i32, %arg1: i32) -> (i32, i32) {
    %c0_i32 = arith.constant 0 : i32
    %c0_i32_0 = arith.constant 0 : i32
    %c0_i32_1 = arith.constant 0 : i32
    return %c0_i32, %c0_i32_0 : i32, i32
  }
  func.func @transform_5(%arg0: i32, %arg1: i32) -> (i32, i32) {
    %c0_i32 = arith.constant 0 : i32
    %c0_i32_0 = arith.constant 0 : i32
    %c0_i32_1 = arith.constant 0 : i32
    return %c0_i32, %c0_i32_0 : i32, i32
  }
  func.func @transform_6(%arg0: i32, %arg1: i32) -> (i32, i32) {
    %c0_i32 = arith.constant 0 : i32
    %c0_i32_0 = arith.constant 0 : i32
    %c0_i32_1 = arith.constant 0 : i32
    return %c0_i32, %c0_i32_0 : i32, i32
  }
  func.func @transform_7(%arg0: i32, %arg1: i32) -> (i32, i32) {
    %c0_i32 = arith.constant 0 : i32
    %c0_i32_0 = arith.constant 0 : i32
    %c0_i32_1 = arith.constant 0 : i32
    return %c0_i32, %c0_i32_0 : i32, i32
  }
  func.func @transform_8(%arg0: i32, %arg1: i32) -> (i32, i32) {
    %c0_i32 = arith.constant 0 : i32
    %c0_i32_0 = arith.constant 0 : i32
    %c0_i32_1 = arith.constant 0 : i32
    return %c0_i32, %c0_i32_0 : i32, i32
  }
  func.func @transform_9(%arg0: i32, %arg1: i32) -> (i32, i32) {
    %c0_i32 = arith.constant 0 : i32
    %c0_i32_0 = arith.constant 0 : i32
    %c0_i32_1 = arith.constant 0 : i32
    return %c0_i32, %c0_i32_0 : i32, i32
  }
  func.func @transform_10(%arg0: i32, %arg1: i32) -> (i32, i32, i32) {
    %c0_i32 = arith.constant 0 : i32
    %c0_i32_0 = arith.constant 0 : i32
    return %arg0, %arg1, %c0_i32 : i32, i32, i32
  }
}

</mosaic_0001>

<bundles_post_ra>
// kernel: tpu_custom_call.1
= control target key start
LH: loop header
LB: loop body
LE: loop exit
PB: predicated region body
PF: predicated region fallthrough
CT: control target
= control target key end

     0   :  { %s4225_s0 = inlined_call_operand.hbm [shape: f32[2,512,128], index: 0, kind: input, shape index: {}]   ;;  %s4226_s1 = inlined_call_operand.hbm [shape: f32[2,16,256], index: 1, kind: input, shape index: {}]   ;;  %s4227_s2 = inlined_call_operand.hbm [shape: f32[1,128], index: 2, kind: input, shape index: {}]   ;;  %s4228_s3 = inlined_call_operand.hbm [shape: f32[1,128], index: 3, kind: input, shape index: {}]   ;;  %s4229_s4 = inlined_call_operand.vmem [shape: f32[1,256], index: 4, kind: input, shape index: {}]   ;;  %s4230_s5 = inlined_call_operand.vmem [shape: f32[1,256], index: 5, kind: input, shape index: {}]   ;;  %s4231_s6 = inlined_call_operand.hbm [shape: bf16[128,128], index: 6, kind: input, shape index: {}]   ;;  %s4232_s7 = inlined_call_operand.vmem [shape: f32[1,128], index: 7, kind: input, shape index: {}]   ;;  %s4233_s8 = inlined_call_operand.hbm [shape: bf16[256,128], index: 8, kind: input, shape index: {}]   ;;  %s4234_s9 = inlined_call_operand.vmem [shape: f32[1,128], index: 9, kind: input, shape index: {}]   ;;  %s4235_s10 = inlined_call_operand.hbm [shape: f32[2,512,128], index: 10, kind: output, shape index: {}]  }
   0x1   :  { %4254 = sst [smem:[#allocation39_spill]] %s4225_s0 }
   0x2   :  { %4255 = sst [smem:[#allocation40_spill]] %s4227_s2 }
   0x3   :  { %4256 = sst [smem:[#allocation41_spill]] %s4228_s3 }
   0x4   :  { %4257 = sst [smem:[#allocation42_spill]] %s4231_s6 }
   0x5   :  { %4258 = sst [smem:[#allocation43_spill]] %s4232_s7 }
   0x6   :  { %4259 = sst [smem:[#allocation44_spill]] %s4233_s8 }
   0x7   :  { %4260 = sst [smem:[#allocation45_spill]] %s4234_s9 }
   0x8   :  { %4261 = sst [smem:[#allocation46_spill]] %s4235_s10 }
   0x9   :  { %15 = vsyncpa [#allocation4], 0 }
   0xa   :  { %17 = vsyncpa [#allocation4 + $0x1], 0 }
   0xb   :  { %18 = vsyncpa [#allocation7], 0 }
   0xc   :  { %20 = vsyncpa [#allocation7 + $0x1], 0 }
   0xd   :  { %21 = vsyncpa [#allocation10], 0 }
   0xe   :  { %22 = vsyncpa [#allocation13], 0 }
   0xf   :  { %23 = vsyncpa [#allocation5], 0 }
  0x10   :  { %25 = vsyncpa [#allocation5 + $0x1], 0  ;;  %s2733_s13 = smov 0   ;;  %s2735_s14 = smov 0  }
  0x11   :  { %s2737_s15 = smov 0   ;;  %s2739_s16 = smov 0  }
  0x12   :  { %s2741_s17 = smov 0   ;;  %s2743_s18 = smov 0  }
  0x13   :  { %s2745_s19 = smov 0   ;;  %s2747_s20 = smov 0  }
  0x14   :  { %s2749_s21 = smov 0   ;;  %s2751_s22 = smov 0  }
  0x15   :  { %s2753_s23 = smov 0  }
  0x16 LB: > { %4262 = sst [smem:[#allocation21_spill]] %s2633_s16  ;;  %s2787_s24 = sadd.s32 4294967295, %s2661_s23   ;;  %s2661_s23 = sphi %s2753_s23, %s31_s23   ;;  %s2657_s22 = sphi %s2751_s22, %s4376_s22   ;;  %s2653_s21 = sphi %s2749_s21, %s4368_s21   ;;  %s2649_s20 = sphi %s2747_s20, %s4375_s20   ;;  %s2645_s19 = sphi %s2745_s19, %s4367_s19   ;;  %s2641_s18 = sphi %s2743_s18, %s4366_s18   ;;  %s2637_s17 = sphi %s2741_s17, %s4374_s17   ;;  %s2633_s16 = sphi %s2739_s16, %s4373_s16   ;;  %s2629_s15 = sphi %s2737_s15, %s4372_s15   ;;  %s2625_s14 = sphi %s2735_s14, %s4371_s14   ;;  %s2621_s13 = sphi %s2733_s13, %s4370_s13  }
  0x17   : > { %4263 = sst [smem:[#allocation22_spill]] %s2641_s18  ;;  %p91_p0 = scmp.ne.s32.totalorder %s2625_s14, %s2621_s13 }
  0x18   : > { %4264 = sst [smem:[#allocation23_spill]] %s2649_s20  ;;  %p66_p1 = scmp.eq.s32.totalorder %s2787_s24, 0 }
  0x19   : > { %4265 = sst [smem:[#allocation24_spill]] %s2653_s21  ;;  %p285_p2 = scmp.eq.s32.totalorder %s2787_s24, 3 }
  0x1a   : > { %p1933_p3 = scmp.ge.s32.totalorder %s2661_s23, 1  ;;  %p298_p4 = scmp.lt.s32.totalorder %s2661_s23, 5 }
  0x1b   : > { %p2796_p5 = por %p91_p0, %p66_p1  ;;  %s4268_s2 = sld [smem:[#allocation40_spill]] }
  0x1c   : > { %p2800_p6 = pnand %p1933_p3, %p298_p4  ;;  %s2663_s30 = smov [#allocation8]  }
  0x1d   : > { %s312_s11 = sshll.u32 %s2663_s30, 4  ;;  %s4270_s3 = sld [smem:[#allocation41_spill]]  ;;  %s313_s11 = int_to_ptr.vmem [resolvable:$true] %s312_s11 }
  0x1e   : > { %p2128_p7 = pneg %p2800_p6  ;;  %s2664_s28 = smov [#allocation9]  }
  0x1f   : > { %s4271_s6 = sld [smem:[#allocation42_spill]]  ;;  %s2665_s10 = smov [#allocation11]  }
  0x20   : > { %p2811_p8 = pnand %p2128_p7, %p66_p1  ;;  %s341_s13 = sshll.u32 %s2665_s10, 4  ;;  %s342_s13 = int_to_ptr.vmem [resolvable:$true] %s341_s13 }
  0x21   : > { %s310_s29 = sshll.u32 %s4268_s2, 4  ;;  %s324_s2 = sshll.u32 %s2664_s28, 4  ;;  %s311_s29 = int_to_ptr.hbm [resolvable:$true] %s310_s29  ;;  %s325_s2 = int_to_ptr.vmem [resolvable:$true] %s324_s2 }
  0x22   : > { %2131 = dma.hbm_to_vmem [thread:$0]  (!%p2811_p8), %s311_s29, 16, %s313_s11, [#allocation7]  }
  0x23   : > { %s322_s27 = sshll.u32 %s4270_s3, 4  ;;  %s2666_s29 = smov 64   ;;  %s323_s27 = int_to_ptr.hbm [resolvable:$true] %s322_s27 }
  0x24   : > { %2134 = dma.hbm_to_vmem [thread:$0]  (!%p2811_p8), %s323_s27, 16, %s325_s2, [#allocation10]  }
  0x25   : > { %s339_s7 = sshll.u32 %s4271_s6, 4  ;;  %s2667_s11 = smov 4   ;;  %s340_s7 = int_to_ptr.hbm [resolvable:$true] %s339_s7 }
  0x26   : > { %2137 = dma.hbm_to_vmem [thread:$0]  (!%p2811_p8), %s340_s7, 1024, %s342_s13, [#allocation10], %s2666_s29, %s2666_s29, %s2667_s11  }
  0x27   : > { %s4272_s8 = sld [smem:[#allocation44_spill]]  ;;  %s2668_s2 = smov [#allocation12]  }
  0x28   : > { %s358_s27 = sshll.u32 %s2668_s2, 4  ;;  %s1932_s10 = sadd.s32 4294967294, %s2661_s23   ;;  %s359_s27 = int_to_ptr.vmem [resolvable:$true] %s358_s27 }
  0x29   : > { %s40_s3 = sadd.s32 1, %s2653_s21  ;;  %s43_s6 = sadd.s32 1, %s2657_s22 }
  0x2a   : > { %p41_p9 = scmp.ge.s32.totalorder %s40_s3, 2  ;;  %s52_s7 = sadd.s32 1, %s2641_s18 }
  0x2b   : > { %p59_p10 = scmp.ne.s32.totalorder %s2641_s18, %s2637_s17  ;;  %p60_p11 = scmp.eq.s32.totalorder %s2661_s23, 0 }
  0x2c   : > { %s4378_s3 = smov (%p41_p9, %s40_s3), 0  ;;  %s4380_s6 = smov (!%p41_p9, %s43_s6), %s2657_s22 }
  0x2d   : > { %s356_s30 = sshll.u32 %s4272_s8, 4  ;;  %4273 = sst [smem:[#allocation25_spill]] %s4378_s3  ;;  %s357_s30 = int_to_ptr.hbm [resolvable:$true] %s356_s30 }
  0x2e   : > { %2140 = dma.hbm_to_vmem [thread:$0]  (!%p2811_p8), %s357_s30, 2048, %s359_s27, [#allocation13], %s2666_s29, %s2666_s29, %s2667_s11  }
  0x2f   : > { %s48_s13 = ssub.s32 %s2653_s21, %s4378_s3  ;;  %p2846_p12 = por %p60_p11, %p59_p10 }
  0x30   : > { %p45_p13 = scmp.ge.s32.totalorder %s4380_s6, 2  ;;  %p65_p0 = scmp.ne.s32.totalorder %s2637_s17, %s2633_s16 }
  0x31   : > { %p2854_p3 = por %p285_p2, %p59_p10  ;;  %p291_p4 = scmp.eq.s32.totalorder %s1932_s10, 3 }
  0x32   : > { %s4382_s6 = smov (%p45_p13, %s4380_s6), 0  ;;  %p2862_p7 = por %p66_p1, %p65_p0 }
  0x33   : > { %s4275_s29 = scalar_select %p2854_p3, 1, 0 }
  0x34   : > { %4277 = sst [smem:[#allocation27_spill]] %s4382_s6  ;;  %p2866_p8 = por %p291_p4, %p65_p0 }
  0x35   : > { %4276 = sst [smem:[#allocation26_spill]] %s4275_s29  ;;  %s47_s28 = ssub.s32 %s2657_s22, %s4382_s6 }
  0x36   : > { %s4279_s20 = scalar_select %p2866_p8, 1, 0 }
  0x37   : > { %p2156_p2 = scmp.lt.s32.totalorder %s2661_s23, 4  ;;  %s49_s30 = sor.u32 %s48_s13, %s47_s28 }
  0x38   : > { %4280 = sst [smem:[#allocation28_spill]] %s4279_s20  ;;  %p76_p9 = scmp.eq.s32.totalorder %s47_s28, 0 }
  0x39   : > { %p50_p10 = scmp.eq.s32.totalorder %s49_s30, 0  ;;  %s375_s2 = sand.u32 1, %s2641_s18  }
  0x3a   : > { %s1939_s27 = sshll.u32 %s375_s2, 8  ;;  %s1940_s8 = sshll.u32 %s2653_s21, 5 }
  0x3b   : > { %s2875_s10 = scalar_select %p50_p10, %s2641_s18, %s52_s7  }
  0x3c   : > { %s1941_s3 = sshll.u32 %s2657_s22, 6  ;;  %s379_s16 = scalar_lea.vmem [#allocation3], %s1939_s27 }
  0x3d   : > { %4281 = sst [smem:[#allocation29_spill]] %s2875_s10  ;;  %s389_s20 = sshll.u32 %s379_s16, 4  ;;  %s390_s20 = int_to_ptr.vmem [resolvable:$true] %s389_s20 }
  0x3e   : > { %s384_s29 = sadd.s32 %s1941_s3, %s1940_s8  ;;  %p2142_p13 = pnand %p2156_p2, %p2846_p12 }
  0x3f   : > { %s1942_s13 = sshll.u32 %s384_s29, 3  ;;  %s4282_s0 = sld [smem:[#allocation39_spill]] }
  0x40   : > { %s376_s10 = scalar_lea.sflag [#allocation4], %s375_s2  ;;  %s2669_s18 = smov 128  }
  0x41   : > { %s2670_s27 = smov 8   ;;  %s399_s16 = sand.u32 1, %s2661_s23  }
  0x42   : > { %s78_s3 = sadd.s32 1, %s2629_s15  ;;  %p85_p0 = scmp.ne.s32.totalorder %s2629_s15, %s2625_s14 }
  0x43   : > { %s2892_s8 = scalar_select %p76_p9, %s2629_s15, %s78_s3  }
  0x44   : > { %p87_p4 = por %p85_p0, %p60_p11  ;;  %s401_s12 = sand.u32 1, %s2629_s15  }
  0x45   : > { %s386_s6 = scalar_lea.hbm %s4282_s0, %s1942_s13  ;;  %s1943_s29 = sshll.u32 %s401_s12, 5 }
  0x46   : > { %s387_s21 = sshll.u32 %s386_s6, 4  ;;  %s2057_s9 = sshll.u32 %s2657_s22, 5  ;;  %s388_s21 = int_to_ptr.hbm [resolvable:$true] %s387_s21 }
  0x47   : > { %2144 = dma.hbm_to_vmem [thread:$0]  (!%p2142_p13), %s388_s21, 4096, %s390_s20, %s376_s10, %s2669_s18, %s2669_s18, %s2670_s27  }
  0x48   : > { %s408_s6 = scalar_lea.hbm %s4226_s1, %s2057_s9  ;;  %s403_s30 = scalar_lea.vmem [#allocation6], %s1943_s29 }
  0x49   : > { %s409_s2 = sshll.u32 %s408_s6, 4  ;;  %s411_s0 = sshll.u32 %s403_s30, 4  ;;  %s410_s2 = int_to_ptr.hbm [resolvable:$true] %s409_s2  ;;  %s412_s0 = int_to_ptr.vmem [resolvable:$true] %s411_s0 }
  0x4a   : > { %p2145_p12 = pnand %p2156_p2, %p87_p4  ;;  %s400_s18 = scalar_lea.sflag [#allocation7], %s399_s16 }
  0x4b   : > { %s2671_s21 = smov 256   ;;  %s2672_s20 = smov 16  }
  0x4c   : > { %2147 = dma.hbm_to_vmem [thread:$0]  (!%p2145_p12), %s410_s2, 512, %s412_s0, %s400_s18, %s2671_s21, %s2671_s21, %s2672_s20  }
  0x4d   : > { %423 = sbr.rel (%p2800_p6) target bundleno = 1051 (0x41b), region = 60 }
  0x52   : > { %s2906_s28 = sand.u32 1, %s2637_s17  }
  0x53   : > { %s1947_s9 = sshll.u32 %s2906_s28, 8  ;;  %s426_s10 = scalar_lea.sflag [#allocation4], %s2906_s28 }
  0x54   : > { %s2910_s27 = scalar_lea.vmem [#allocation3], %s1947_s9 }
  0x55   : > { %2596 = dma.done.wait (%p2862_p7), %s426_s10, 4096  }
  0x56   : > { %2598 = vsyncadd (%p2862_p7), %s426_s10, 4294963200  ;;  %s435_s0 = sand.u32 1, %s2787_s24   ;;  %s437_s26 = sand.u32 1, %s2625_s14  }
  0x57   : > { %s1948_s16 = sshll.u32 %s437_s26, 5  ;;  %s436_s3 = scalar_lea.sflag [#allocation7], %s435_s0 }
  0x58   : > { %s439_s12 = scalar_lea.vmem [#allocation6], %s1948_s16 }
  0x59   : > { %2600 = dma.done.wait (%p2796_p5), %s436_s3, 512  }
  0x5a   : > { %2602 = vsyncadd (%p2796_p5), %s436_s3, 4294966784 }
  0x5b   : > { %2604 = dma.done.wait (%p66_p1), [#allocation7], 16  }
  0x5c   : > { %2606 = vsyncadd (%p66_p1), [#allocation7], 4294967280 }
  0x5d   : > { %2608 = dma.done.wait (%p66_p1), [#allocation10], 1040  }
  0x5e   : > { %2610 = vsyncadd (%p66_p1), [#allocation10], 4294966256 }
  0x5f   : > { %2612 = dma.done.wait (%p66_p1), [#allocation13], 2048  }
  0x60   : > { %2614 = vsyncadd (%p66_p1), [#allocation13], 4294965248  ;;  %s2934_s25 = scalar_lea.vmem [#allocation14], %s1947_s9  ;;  %p1954_p5 = scmp.ne.s32.totalorder %s2645_s19, 0 }
  0x61   : > { %s4283_s2 = sld [smem:[#allocation45_spill]] (!%p1954_p5) }
  0x62   : > { %507 = sbr.rel (%p1954_p5) target bundleno = 534 (0x216), region = 88 }
  0x67   : > { %v508_v0 = vld [vmem:[%s439_s12] sm:$0xff]  ;;  %v509_v1 = vld [vmem:[%s439_s12 + $0x8] sm:$0xff]  ;;  %v510_v3 = vld [vmem:[%s439_s12 + $0x10] sm:$0xff]  ;;  %v2673_v6 = vmov 256.0   ;;  %v2674_v58 = vmov 16.0  }
  0x68   : > { %v514_v2 = vadd.f32 %v509_v1, %v508_v0  ;;  %v511_v4 = vld [vmem:[%s439_s12 + $0x18] sm:$0xff]  ;;  %2265 = vrcp.f32 %v2673_v6  ;;  %v2063_v31 = vld [vmem:[#allocation12 + $0x28] sm:$0xff]  ;;  %v2062_v35 = vld [vmem:[#allocation12 + $0x20] sm:$0xff] }
  0x69   : > { %v517_v5 = vadd.f32 %v511_v4, %v510_v3  ;;  %v2065_v27 = vld [vmem:[#allocation12 + $0x38] sm:$0xff]  ;;  %v2064_v29 = vld [vmem:[#allocation12 + $0x30] sm:$0xff]  ;;  %v2071_v32 = vld [vmem:[#allocation12 + $0x68] sm:$0xff] }
  0x6a   : > { %515 = vadd.xlane.f32.xlu0 %v514_v2  ;;  %v2073_v28 = vld [vmem:[#allocation12 + $0x78] sm:$0xff]  ;;  %743 = vmatpush.bf16.msra.mxu0 %v2065_v27  ;;  %v2072_v30 = vld [vmem:[#allocation12 + $0x70] sm:$0xff]  ;;  %v2070_v36 = vld [vmem:[#allocation12 + $0x60] sm:$0xff] }
  0x6b   : > { %756 = vmatpush.bf16.msra.mxu1 %v2073_v28  ;;  %v2061_v38 = vld [vmem:[#allocation12 + $0x18] sm:$0xff]  ;;  %v2060_v41 = vld [vmem:[#allocation12 + $0x10] sm:$0xff]  ;;  %v2059_v47 = vld [vmem:[#allocation12 + $0x8] sm:$0xff] }
  0x6c   : > { %v2069_v39 = vld [vmem:[#allocation12 + $0x58] sm:$0xff]  ;;  %v2068_v42 = vld [vmem:[#allocation12 + $0x50] sm:$0xff]  ;;  %v2067_v48 = vld [vmem:[#allocation12 + $0x48] sm:$0xff] }
  0x6d   : > { %v2058_v51 = vld [vmem:[#allocation12] sm:$0xff]  ;;  %v512_v59 = vld [vmem:[%s4229_s4] sm:$0x3] }
  0x6e   : > { %v2266_v7 = vpop.eup %2265  ;;  %744 = vmatpush.bf16.msra.mxu0 %v2064_v29  ;;  %v2066_v52 = vld [vmem:[#allocation12 + $0x40] sm:$0xff]  ;;  %v572_v63 = vperm.slane %v512_v59, 0 }
  0x6f   : > { %v521_v8 = vmul.f32 256.0, %v2266_v7  ;;  %vm525_vm0 = vweird.f32 %v2266_v7  ;;  %757 = vmatpush.bf16.msra.mxu1 %v2072_v30 }
  0x71   : > { %v522_v9 = vsub.f32 1.0, %v521_v8 }
  0x72   : > { %518 = vadd.xlane.f32.xlu0 %v517_v5  ;;  %745 = vmatpush.bf16.msra.mxu0 %v2063_v31 }
  0x73   : > { %v523_v10 = vmul.f32 %v2266_v7, %v522_v9  ;;  %758 = vmatpush.bf16.msra.mxu1 %v2071_v32 }
  0x75   : > { %v524_v11 = vadd.f32 %v2266_v7, %v523_v10 }
  0x76   : > { %746 = vmatpush.bf16.msra.mxu0 %v2062_v35 }
  0x77   : > { %v526_v12 = vsel %vm525_vm0, %v2266_v7, %v524_v11  ;;  %759 = vmatpush.bf16.msra.mxu1 %v2070_v36 }
  0x7a   : > { %747 = vmatpush.bf16.msra.mxu0 %v2061_v38 }
  0x7b   : > { %760 = vmatpush.bf16.msra.mxu1 %v2069_v39 }
  0x7e   : > { %748 = vmatpush.bf16.msra.mxu0 %v2060_v41 }
  0x7f   : > { %761 = vmatpush.bf16.msra.mxu1 %v2068_v42  ;;  %v646_v42 = vld [vmem:[%s4283_s2] sm:$0x1] }
  0x82   : > { %749 = vmatpush.bf16.msra.mxu0 %v2059_v47 }
  0x83   : > { %762 = vmatpush.bf16.msra.mxu1 %v2067_v48 }
  0x86   : > { %750 = vmatpush.bf16.msra.mxu0 %v2058_v51 }
  0x87   : > { %763 = vmatpush.bf16.msra.mxu1 %v2066_v52 }
  0xdd   : > { %v516_v13 = vpop.xlane.xlu0 %515 }
  0xde   : > { %v527_v14 = vmul.f32 %v526_v12, %v516_v13 }
  0xe0   : > { %v2937_v15 = vsub.f32 %v508_v0, %v527_v14  ;;  %v2939_v16 = vsub.f32 %v509_v1, %v527_v14  ;;  %v573_v0 = vperm.slane %v512_v59, 1 }
  0xe2   : > { %v533_v17 = vmul.f32 %v2937_v15, %v2937_v15  ;;  %v534_v18 = vmul.f32 %v2939_v16, %v2939_v16 }
  0xe4   : > { %v537_v19 = vadd.f32 %v534_v18, %v533_v17 }
  0xe5   : > { %v519_v20 = vpop.xlane.xlu0 %518 }
  0xe6   : > { %v528_v21 = vmul.f32 %v526_v12, %v519_v20  ;;  %538 = vadd.xlane.f32.xlu1 %v537_v19 }
  0xe8   : > { %v2945_v22 = vsub.f32 %v510_v3, %v528_v21  ;;  %v2947_v23 = vsub.f32 %v511_v4, %v528_v21  ;;  %v513_v3 = vld [vmem:[%s4230_s5] sm:$0x3] }
  0xe9   : > { %v581_v7 = vperm.slane %v513_v3, 0  ;;  %v582_v8 = vperm.slane %v513_v3, 1 }
  0xea   : > { %v535_v24 = vmul.f32 %v2945_v22, %v2945_v22  ;;  %v536_v25 = vmul.f32 %v2947_v23, %v2947_v23 }
  0xec   : > { %v540_v26 = vadd.f32 %v536_v25, %v535_v24 }
  0xee   : > { %541 = vadd.xlane.f32.xlu1 %v540_v26 }
 0x159   : > { %v539_v33 = vpop.xlane.xlu1 %538 }
 0x15a   : > { %v543_v34 = vmul.f32 %v539_v33, %v526_v12 }
 0x15c   : > { %v545_v37 = vadd.f32 1e-05, %v543_v34 }
 0x15e   : > { %2267 = vrsqrt.f32 %v545_v37  ;;  %vm553_vm2 = vweird.f32 %v545_v37 }
 0x161   : > { %v542_v40 = vpop.xlane.xlu1 %541 }
 0x162   : > { %v544_v43 = vmul.f32 %v542_v40, %v526_v12 }
 0x164   : > { %v2268_v44 = vpop.eup %2267  ;;  %v546_v45 = vadd.f32 1e-05, %v544_v43 }
 0x165   : > { %v548_v46 = vmul.f32 %v2268_v44, %v545_v37  ;;  %vm554_vm1 = vweird.f32 %v2268_v44 }
 0x166   : > { %2269 = vrsqrt.f32 %v546_v45  ;;  %vm555_vm3 = vmor %vm553_vm2, %vm554_vm1  ;;  %vm563_vm5 = vweird.f32 %v546_v45 }
 0x167   : > { %v549_v49 = vmul.f32 %v2268_v44, %v548_v46  ;;  %2271 = vrcp.f32 %v2674_v58 }
 0x169   : > { %v550_v50 = vmul.f32 0.5, %v549_v49 }
 0x16b   : > { %v551_v53 = vsub.f32 1.5, %v550_v50 }
 0x16c   : > { %v2270_v54 = vpop.eup %2269 }
 0x16d   : > { %v552_v55 = vmul.f32 %v2268_v44, %v551_v53  ;;  %v558_v56 = vmul.f32 %v2270_v54, %v546_v45  ;;  %vm564_vm4 = vweird.f32 %v2270_v54  ;;  %v2272_v5 = vpop.eup %2271 }
 0x16e   : > { %vm565_vm6 = vmor %vm563_vm5, %vm564_vm4  ;;  %v604_v13 = vmul.f32 16.0, %v2272_v5  ;;  %vm608_vm7 = vweird.f32 %v2272_v5 }
 0x16f   : > { %v559_v57 = vmul.f32 %v2270_v54, %v558_v56  ;;  %v556_v60 = vsel %vm555_vm3, %v2268_v44, %v552_v55 }
 0x170   : > { %v567_v1 = vmul.f32 %v556_v60, %v2937_v15  ;;  %v568_v2 = vmul.f32 %v556_v60, %v2939_v16  ;;  %v605_v20 = vsub.f32 1.0, %v604_v13 }
 0x171   : > { %v560_v61 = vmul.f32 0.5, %v559_v57 }
 0x172   : > { %v576_v9 = vmul.f32 %v572_v63, %v567_v1  ;;  %v577_v10 = vmul.f32 %v573_v0, %v568_v2  ;;  %v606_v27 = vmul.f32 %v2272_v5, %v605_v20 }
 0x173   : > { %v561_v62 = vsub.f32 1.5, %v560_v61 }
 0x174   : > { %v585_v16 = vadd.f32 %v581_v7, %v576_v9  ;;  %v586_v18 = vadd.f32 %v582_v8, %v577_v10 }
 0x175   : > { %v562_v4 = vmul.f32 %v2270_v54, %v561_v62 }
 0x177   : > { %v566_v6 = vsel %vm565_vm6, %v2270_v54, %v562_v4 }
 0x178   : > { %v569_v11 = vmul.f32 %v566_v6, %v2945_v22  ;;  %v570_v12 = vmul.f32 %v566_v6, %v2947_v23  ;;  %v607_v22 = vadd.f32 %v2272_v5, %v606_v27 }
 0x17a   : > { %v578_v14 = vmul.f32 %v572_v63, %v569_v11  ;;  %v579_v15 = vmul.f32 %v573_v0, %v570_v12  ;;  %v609_v35 = vsel %vm608_vm7, %v2272_v5, %v607_v22 }
 0x17c   : > { %v587_v17 = vadd.f32 %v581_v7, %v578_v14  ;;  %v588_v19 = vadd.f32 %v582_v8, %v579_v15 }
 0x17e   : > { %v589_v21 = vadd.f32 %v587_v17, %v585_v16  ;;  %v596_v24 = vadd.f32 %v588_v19, %v586_v18 }
 0x180   : > { %v590_v25 = vrot.slane %v589_v21, 4  ;;  %v597_v26 = vrot.slane %v596_v24, 4 }
 0x182   : > { %v591_v28 = vadd.f32 %v590_v25, %v589_v21  ;;  %v598_v29 = vadd.f32 %v597_v26, %v596_v24 }
 0x184   : > { %v592_v30 = vrot.slane %v591_v28, 2  ;;  %v599_v31 = vrot.slane %v598_v29, 2 }
 0x186   : > { %v593_v32 = vadd.f32 %v592_v30, %v591_v28  ;;  %v600_v23 = vadd.f32 %v599_v31, %v598_v29 }
 0x188   : > { %v594_v33 = vrot.slane %v593_v32, 1  ;;  %v601_v34 = vrot.slane %v600_v23, 1 }
 0x18a   : > { %v595_v36 = vadd.f32 %v594_v33, %v593_v32  ;;  %v602_v37 = vadd.f32 %v601_v34, %v600_v23 }
 0x18c   : > { %v610_v38 = vmul.f32 %v609_v35, %v595_v36  ;;  %v611_v39 = vmul.f32 %v609_v35, %v602_v37 }
 0x18e   : > { %v612_v40 = vpack.c.bf16 %v610_v38, %v610_v38  ;;  %v613_v41 = vpack.c.bf16 %v611_v39, %v611_v39 }
 0x190   : > { %751 = vmatmul.bf16.vlgmr.msra.gmra.mxu0 %v612_v40  ;;  %764 = vmatmul.bf16.vlgmr.msra.gmra.mxu1 %v613_v41 }
 0x20d   : > { %v752_v43 = vpop.f32.mrf.mxu0  ;;  %v765_v44 = vpop.f32.mrf.mxu1 }
 0x20e   : > { %v753_v45 = vadd.f32 %v752_v43, %v646_v42 }
 0x210   : > { %v766_v46 = vadd.f32 %v765_v44, %v753_v45 }
 0x212   : > { %769 = vst [vmem:[#allocation2] sm:$0x1] %v766_v46 }
 0x215   : > { %v754_v47 = vpop.f32.mrf.mxu0  ;;  %v767_v48 = vpop.f32.mrf.mxu1 }
 0x216 PF: > { %v2967_v49 = vld [vmem:[%s2910_s27 + $0xc0] sm:$0xff]  ;;  %v2979_v52 = vld [vmem:[%s2910_s27 + $0xc8] sm:$0xff]  ;;  %v2997_v57 = vld [vmem:[%s2910_s27 + $0x90] sm:$0xff]  ;;  %v2675_v17 = vmov 128.0   ;;  %s4358_s21 = sld [smem:[#allocation43_spill]]  ;;  %s2052_s9 = sshll.u32 %s2645_s19, 5 }
 0x217   : > { %v2970_v50 = vld [vmem:[%s2910_s27 + $0x80] sm:$0xff]  ;;  %852 = vadd.xlane.f32.xlu1 %v2967_v49  ;;  %v2982_v53 = vld [vmem:[%s2910_s27 + $0x88] sm:$0xff]  ;;  %v3003_v58 = vld [vmem:[%s2910_s27 + $0xd0] sm:$0xff]  ;;  %2277 = vrcp.f32 %v2675_v17  ;;  %s4359_s20 = sld [smem:[#allocation23_spill]]  ;;  %s1777_s24 = sshll.u32 %s2934_s25, 4  ;;  %s1778_s24 = int_to_ptr.vmem [resolvable:$true] %s1777_s24 }
 0x218   : > { %v2973_v51 = vld [vmem:[%s2910_s27] sm:$0xff]  ;;  %836 = vadd.xlane.f32.xlu0 %v2970_v50  ;;  %v2985_v54 = vld [vmem:[%s2910_s27 + $0x8] sm:$0xff]  ;;  %v3006_v59 = vld [vmem:[%s2910_s27 + $0x98] sm:$0xff]  ;;  %s4360_s16 = sld [smem:[#allocation46_spill]]  ;;  %s1763_s7 = scalar_lea.sflag [#allocation5], %s2906_s28 }
 0x219   : > { %804 = vadd.xlane.f32.xlu2 %v2973_v51  ;;  %v2991_v55 = vld [vmem:[%s2910_s27 + $0x48] sm:$0xff]  ;;  %v2994_v56 = vld [vmem:[%s2910_s27 + $0x40] sm:$0xff]  ;;  %v3009_v60 = vld [vmem:[%s2910_s27 + $0xd8] sm:$0xff] }
 0x21a   : > { %v3015_v61 = vld [vmem:[%s2910_s27 + $0x18] sm:$0xff]  ;;  %v3018_v62 = vld [vmem:[%s2910_s27 + $0x10] sm:$0xff]  ;;  %v3027_v0 = vld [vmem:[%s2910_s27 + $0xa0] sm:$0xff] }
 0x21b   : > { %v3021_v63 = vld [vmem:[%s2910_s27 + $0x50] sm:$0xff]  ;;  %v3030_v1 = vld [vmem:[%s2910_s27 + $0x58] sm:$0xff]  ;;  %v3033_v2 = vld [vmem:[%s2910_s27 + $0xa8] sm:$0xff] }
 0x21c   : > { %v3039_v3 = vld [vmem:[%s2910_s27 + $0xe8] sm:$0xff]  ;;  %v3042_v4 = vld [vmem:[%s2910_s27 + $0xe0] sm:$0xff]  ;;  %v3063_v9 = vld [vmem:[%s2910_s27 + $0xb0] sm:$0xff] }
 0x21d   : > { %v3045_v5 = vld [vmem:[%s2910_s27 + $0x20] sm:$0xff]  ;;  %v3054_v7 = vld [vmem:[%s2910_s27 + $0x28] sm:$0xff]  ;;  %v3066_v10 = vld [vmem:[%s2910_s27 + $0xf0] sm:$0xff]  ;;  %v2278_v18 = vpop.eup %2277  ;;  %s2053_s10 = sshll.u32 %s4359_s20, 6 }
 0x21e   : > { %v3051_v6 = vld [vmem:[%s2910_s27 + $0x60] sm:$0xff]  ;;  %v3057_v8 = vld [vmem:[%s2910_s27 + $0x68] sm:$0xff]  ;;  %v3069_v11 = vld [vmem:[%s2910_s27 + $0xb8] sm:$0xff]  ;;  %v869_v19 = vmul.f32 128.0, %v2278_v18  ;;  %vm873_vm8 = vweird.f32 %v2278_v18  ;;  %s4361_s3 = smov %s4360_s16 }
 0x21f   : > { %854 = vadd.xlane.f32.xlu1 %v2979_v52  ;;  %v3075_v12 = vld [vmem:[%s2910_s27 + $0xf8] sm:$0xff]  ;;  %v3078_v13 = vld [vmem:[%s2910_s27 + $0x30] sm:$0xff]  ;;  %s2543_s18 = scalar_lea.hbm %s4361_s3, 1024 }
 0x220   : > { %838 = vadd.xlane.f32.xlu0 %v2982_v53  ;;  %v3081_v14 = vld [vmem:[%s2910_s27 + $0x70] sm:$0xff]  ;;  %v3087_v15 = vld [vmem:[%s2910_s27 + $0x38] sm:$0xff]  ;;  %v870_v20 = vsub.f32 1.0, %v869_v19 }
 0x221   : > { %806 = vadd.xlane.f32.xlu2 %v2985_v54  ;;  %v3090_v16 = vld [vmem:[%s2910_s27 + $0x78] sm:$0xff]  ;;  %s1774_s27 = sadd.s32 %s2053_s10, %s2052_s9 }
 0x222   : > { %v871_v21 = vmul.f32 %v2278_v18, %v870_v20  ;;  %s2054_s19 = sshll.u32 %s1774_s27, 3 }
 0x223   : > { %s1776_s12 = scalar_lea.hbm %s4360_s16, %s2054_s19 }
 0x224   : > { %v872_v24 = vadd.f32 %v2278_v18, %v871_v21  ;;  %s1779_s29 = sshll.u32 %s1776_s12, 4  ;;  %s1780_s29 = int_to_ptr.hbm [resolvable:$true] %s1779_s29 }
 0x225   : > { %s2537_s13 = sshra.s32 %s1780_s29, 4  ;;  %s2538_s13 = int_to_ptr.hbm [resolvable:$true] %s2537_s13 }
 0x226   : > { %v3094_v25 = vsel %vm873_vm8, %v2278_v18, %v872_v24  ;;  %s2539_s6 = scalar_lea.hbm %s2538_s13, 256  ;;  %p2544_p7 = scmp.lt.s32.totalorder %s2538_s13, %s4361_s3 }
 0x227   : > { %822 = vadd.xlane.f32.xlu1 %v2991_v55  ;;  %p2540_p1 = scmp.ne.s32.totalorder %s2538_s13, %s2539_s6  ;;  %p2545_p2 = scmp.lt.s32.totalorder %s2543_s18, %s2539_s6 }
 0x228   : > { %820 = vadd.xlane.f32.xlu0 %v2994_v56 }
 0x229   : > { %840 = vadd.xlane.f32.xlu2 %v2997_v57  ;;  %p2541_p6 = pnand %p2540_p1, %p2854_p3  ;;  %p2546_p9 = por %p2545_p2, %p2544_p7 }
 0x22b   : > { %p2542_p11 = pneg %p2541_p6 }
 0x22d   : > { %p2547_p10 = pnand %p2546_p9, %p2542_p11 }
 0x22f   : > { %856 = vadd.xlane.f32.xlu1 %v3003_v58 }
 0x230   : > { %842 = vadd.xlane.f32.xlu0 %v3006_v59 }
 0x231   : > { %858 = vadd.xlane.f32.xlu2 %v3009_v60 }
 0x237   : > { %810 = vadd.xlane.f32.xlu1 %v3015_v61 }
 0x238   : > { %808 = vadd.xlane.f32.xlu0 %v3018_v62 }
 0x239   : > { %824 = vadd.xlane.f32.xlu2 %v3021_v63 }
 0x23f   : > { %844 = vadd.xlane.f32.xlu1 %v3027_v0 }
 0x240   : > { %826 = vadd.xlane.f32.xlu0 %v3030_v1 }
 0x241   : > { %846 = vadd.xlane.f32.xlu2 %v3033_v2 }
 0x247   : > { %862 = vadd.xlane.f32.xlu1 %v3039_v3 }
 0x248   : > { %860 = vadd.xlane.f32.xlu0 %v3042_v4 }
 0x249   : > { %812 = vadd.xlane.f32.xlu2 %v3045_v5 }
 0x24f   : > { %828 = vadd.xlane.f32.xlu1 %v3051_v6 }
 0x250   : > { %814 = vadd.xlane.f32.xlu0 %v3054_v7 }
 0x251   : > { %830 = vadd.xlane.f32.xlu2 %v3057_v8 }
 0x257   : > { %848 = vadd.xlane.f32.xlu1 %v3063_v9 }
 0x258   : > { %864 = vadd.xlane.f32.xlu0 %v3066_v10 }
 0x259   : > { %850 = vadd.xlane.f32.xlu2 %v3069_v11 }
 0x25f   : > { %866 = vadd.xlane.f32.xlu1 %v3075_v12 }
 0x260   : > { %816 = vadd.xlane.f32.xlu0 %v3078_v13 }
 0x261   : > { %832 = vadd.xlane.f32.xlu2 %v3081_v14 }
 0x267   : > { %818 = vadd.xlane.f32.xlu1 %v3087_v15 }
 0x268   : > { %834 = vadd.xlane.f32.xlu0 %v3090_v16 }
 0x28a   : > { %v853_v26 = vpop.xlane.xlu1 %852 }
 0x28b   : > { %v837_v27 = vpop.xlane.xlu0 %836  ;;  %v899_v28 = vmul.f32 %v3094_v25, %v853_v26 }
 0x28c   : > { %v891_v29 = vmul.f32 %v3094_v25, %v837_v27  ;;  %v805_v30 = vpop.xlane.xlu2 %804 }
 0x28d   : > { %v3099_v31 = vsub.f32 %v2967_v49, %v899_v28  ;;  %v875_v33 = vmul.f32 %v3094_v25, %v805_v30 }
 0x28e   : > { %v3102_v22 = vsub.f32 %v2970_v50, %v891_v29 }
 0x28f   : > { %v963_v23 = vmul.f32 %v3099_v31, %v3099_v31  ;;  %v3112_v39 = vsub.f32 %v2973_v51, %v875_v33 }
 0x290   : > { %v955_v32 = vmul.f32 %v3102_v22, %v3102_v22 }
 0x291   : > { %1019 = vadd.xlane.f32.xlu2 %v963_v23  ;;  %v939_v45 = vmul.f32 %v3112_v39, %v3112_v39 }
 0x292   : > { %1003 = vadd.xlane.f32.xlu0 %v955_v32  ;;  %v855_v34 = vpop.xlane.xlu1 %854 }
 0x293   : > { %v839_v35 = vpop.xlane.xlu0 %838  ;;  %v900_v36 = vmul.f32 %v3094_v25, %v855_v34 }
 0x294   : > { %v892_v37 = vmul.f32 %v3094_v25, %v839_v35  ;;  %v807_v38 = vpop.xlane.xlu2 %806 }
 0x295   : > { %v3115_v40 = vsub.f32 %v2979_v52, %v900_v36  ;;  %v876_v42 = vmul.f32 %v3094_v25, %v807_v38 }
 0x296   : > { %v3118_v41 = vsub.f32 %v2982_v53, %v892_v37 }
 0x297   : > { %v964_v44 = vmul.f32 %v3115_v40, %v3115_v40  ;;  %v3128_v48 = vsub.f32 %v2985_v54, %v876_v42 }
 0x298   : > { %v956_v43 = vmul.f32 %v3118_v41, %v3118_v41 }
 0x299   : > { %971 = vadd.xlane.f32.xlu2 %v939_v45  ;;  %v940_v19 = vmul.f32 %v3128_v48, %v3128_v48 }
 0x29a   : > { %1005 = vadd.xlane.f32.xlu1 %v956_v43  ;;  %1021 = vadd.xlane.f32.xlu0 %v964_v44  ;;  %v823_v46 = vpop.xlane.xlu1 %822 }
 0x29b   : > { %v821_v47 = vpop.xlane.xlu0 %820  ;;  %v884_v49 = vmul.f32 %v3094_v25, %v823_v46 }
 0x29c   : > { %v883_v50 = vmul.f32 %v3094_v25, %v821_v47  ;;  %v841_v51 = vpop.xlane.xlu2 %840 }
 0x29d   : > { %v3133_v52 = vsub.f32 %v2991_v55, %v884_v49  ;;  %v893_v17 = vmul.f32 %v3094_v25, %v841_v51 }
 0x29e   : > { %v3136_v53 = vsub.f32 %v2994_v56, %v883_v50 }
 0x29f   : > { %v948_v54 = vmul.f32 %v3133_v52, %v3133_v52  ;;  %v3146_v21 = vsub.f32 %v2997_v57, %v893_v17 }
 0x2a0   : > { %v947_v18 = vmul.f32 %v3136_v53, %v3136_v53 }
 0x2a1   : > { %989 = vadd.xlane.f32.xlu2 %v948_v54  ;;  %v957_v32 = vmul.f32 %v3146_v21, %v3146_v21 }
 0x2a2   : > { %987 = vadd.xlane.f32.xlu1 %v947_v18  ;;  %973 = vadd.xlane.f32.xlu0 %v940_v19  ;;  %v857_v20 = vpop.xlane.xlu1 %856 }
 0x2a3   : > { %v843_v55 = vpop.xlane.xlu0 %842  ;;  %v901_v56 = vmul.f32 %v3094_v25, %v857_v20 }
 0x2a4   : > { %v894_v24 = vmul.f32 %v3094_v25, %v843_v55  ;;  %v859_v26 = vpop.xlane.xlu2 %858 }
 0x2a5   : > { %v3151_v27 = vsub.f32 %v3003_v58, %v901_v56  ;;  %v902_v29 = vmul.f32 %v3094_v25, %v859_v26 }
 0x2a6   : > { %v3154_v28 = vsub.f32 %v3006_v59, %v894_v24 }
 0x2a7   : > { %v965_v57 = vmul.f32 %v3151_v27, %v3151_v27  ;;  %v3164_v33 = vsub.f32 %v3009_v60, %v902_v29 }
 0x2a8   : > { %v958_v30 = vmul.f32 %v3154_v28, %v3154_v28 }
 0x2a9   : > { %v966_v43 = vmul.f32 %v3164_v33, %v3164_v33 }
 0x2aa   : > { %1023 = vadd.xlane.f32.xlu0 %v965_v57  ;;  %1007 = vadd.xlane.f32.xlu1 %v957_v32  ;;  %v811_v23 = vpop.xlane.xlu1 %810 }
 0x2ab   : > { %1009 = vadd.xlane.f32.xlu2 %v958_v30  ;;  %v809_v58 = vpop.xlane.xlu0 %808  ;;  %v878_v59 = vmul.f32 %v3094_v25, %v811_v23 }
 0x2ac   : > { %v877_v34 = vmul.f32 %v3094_v25, %v809_v58  ;;  %v825_v35 = vpop.xlane.xlu2 %824 }
 0x2ad   : > { %v3169_v36 = vsub.f32 %v3015_v61, %v878_v59  ;;  %v885_v38 = vmul.f32 %v3094_v25, %v825_v35 }
 0x2ae   : > { %v3172_v37 = vsub.f32 %v3018_v62, %v877_v34 }
 0x2af   : > { %v942_v60 = vmul.f32 %v3169_v36, %v3169_v36  ;;  %v3182_v45 = vsub.f32 %v3021_v63, %v885_v38 }
 0x2b0   : > { %v941_v42 = vmul.f32 %v3172_v37, %v3172_v37 }
 0x2b1   : > { %v949_v18 = vmul.f32 %v3182_v45, %v3182_v45 }
 0x2b2   : > { %977 = vadd.xlane.f32.xlu0 %v942_v60  ;;  %1025 = vadd.xlane.f32.xlu1 %v966_v43  ;;  %v845_v44 = vpop.xlane.xlu1 %844 }
 0x2b3   : > { %975 = vadd.xlane.f32.xlu2 %v941_v42  ;;  %v827_v61 = vpop.xlane.xlu0 %826  ;;  %v895_v62 = vmul.f32 %v3094_v25, %v845_v44 }
 0x2b4   : > { %v886_v46 = vmul.f32 %v3094_v25, %v827_v61  ;;  %v847_v47 = vpop.xlane.xlu2 %846 }
 0x2b5   : > { %v3187_v49 = vsub.f32 %v3027_v0, %v895_v62  ;;  %v896_v51 = vmul.f32 %v3094_v25, %v847_v47 }
 0x2b6   : > { %v3190_v50 = vsub.f32 %v3030_v1, %v886_v46 }
 0x2b7   : > { %v959_v63 = vmul.f32 %v3187_v49, %v3187_v49  ;;  %v3200_v19 = vsub.f32 %v3033_v2, %v896_v51 }
 0x2b8   : > { %v950_v17 = vmul.f32 %v3190_v50, %v3190_v50 }
 0x2b9   : > { %v960_v30 = vmul.f32 %v3200_v19, %v3200_v19 }
 0x2ba   : > { %1011 = vadd.xlane.f32.xlu0 %v959_v63  ;;  %991 = vadd.xlane.f32.xlu1 %v949_v18  ;;  %v863_v54 = vpop.xlane.xlu1 %862 }
 0x2bb   : > { %993 = vadd.xlane.f32.xlu2 %v950_v17  ;;  %v861_v0 = vpop.xlane.xlu0 %860  ;;  %v904_v1 = vmul.f32 %v3094_v25, %v863_v54 }
 0x2bc   : > { %v903_v20 = vmul.f32 %v3094_v25, %v861_v0  ;;  %v813_v55 = vpop.xlane.xlu2 %812 }
 0x2bd   : > { %v3205_v56 = vsub.f32 %v3039_v3, %v904_v1  ;;  %v879_v26 = vmul.f32 %v3094_v25, %v813_v55 }
 0x2be   : > { %v3208_v24 = vsub.f32 %v3042_v4, %v903_v20 }
 0x2bf   : > { %v968_v2 = vmul.f32 %v3205_v56, %v3205_v56  ;;  %v3218_v32 = vsub.f32 %v3045_v5, %v879_v26 }
 0x2c0   : > { %v967_v29 = vmul.f32 %v3208_v24, %v3208_v24 }
 0x2c1   : > { %v943_v42 = vmul.f32 %v3218_v32, %v3218_v32 }
 0x2c2   : > { %1029 = vadd.xlane.f32.xlu0 %v968_v2  ;;  %1013 = vadd.xlane.f32.xlu1 %v960_v30  ;;  %v829_v57 = vpop.xlane.xlu1 %828 }
 0x2c3   : > { %1027 = vadd.xlane.f32.xlu2 %v967_v29  ;;  %v815_v3 = vpop.xlane.xlu0 %814  ;;  %v887_v4 = vmul.f32 %v3094_v25, %v829_v57 }
 0x2c4   : > { %v880_v23 = vmul.f32 %v3094_v25, %v815_v3  ;;  %v831_v58 = vpop.xlane.xlu2 %830 }
 0x2c5   : > { %v3223_v59 = vsub.f32 %v3051_v6, %v887_v4  ;;  %v888_v35 = vmul.f32 %v3094_v25, %v831_v58 }
 0x2c6   : > { %v3226_v34 = vsub.f32 %v3054_v7, %v880_v23 }
 0x2c7   : > { %v951_v5 = vmul.f32 %v3223_v59, %v3223_v59  ;;  %v3236_v43 = vsub.f32 %v3057_v8, %v888_v35  ;;  %v2081_v35 = vld [vmem:[#allocation11 + $0x38] sm:$0xff] }
 0x2c8   : > { %v944_v38 = vmul.f32 %v3226_v34, %v3226_v34  ;;  %2083 = vmatpush.bf16.msra.mxu2 %v2081_v35  ;;  %2084 = vmatpush.bf16.msra.mxu3 %v2081_v35 }
 0x2c9   : > { %4284 = vst [vmem:[#allocation30_spill] sm:$0xff] %v3236_v43  ;;  %v952_v8 = vmul.f32 %v3236_v43, %v3236_v43  ;;  %1605 = vmatpush.bf16.msra.mxu0 %v2081_v35  ;;  %2082 = vmatpush.bf16.msra.mxu1 %v2081_v35 }
 0x2ca   : > { %995 = vadd.xlane.f32.xlu0 %v951_v5  ;;  %979 = vadd.xlane.f32.xlu1 %v943_v42  ;;  %v849_v60 = vpop.xlane.xlu1 %848  ;;  %v2077_v5 = vld [vmem:[#allocation11 + $0x18] sm:$0xff]  ;;  %v2076_v42 = vld [vmem:[#allocation11 + $0x10] sm:$0xff] }
 0x2cb   : > { %981 = vadd.xlane.f32.xlu2 %v944_v38  ;;  %v865_v6 = vpop.xlane.xlu0 %864  ;;  %v897_v7 = vmul.f32 %v3094_v25, %v849_v60  ;;  %v2078_v38 = vld [vmem:[#allocation11 + $0x20] sm:$0xff] }
 0x2cc   : > { %v851_v44 = vpop.xlane.xlu2 %850  ;;  %v905_v47 = vmul.f32 %v3094_v25, %v865_v6 }
 0x2cd   : > { %v898_v61 = vmul.f32 %v3094_v25, %v851_v44  ;;  %v3241_v62 = vsub.f32 %v3063_v9, %v897_v7 }
 0x2ce   : > { %v3254_v18 = vsub.f32 %v3066_v10, %v905_v47 }
 0x2cf   : > { %4285 = vst [vmem:[#allocation31_spill] sm:$0xff] %v3241_v62  ;;  %v3244_v46 = vsub.f32 %v3069_v11, %v898_v61  ;;  %v961_v51 = vmul.f32 %v3241_v62, %v3241_v62  ;;  %v2075_v61 = vld [vmem:[#allocation11 + $0x8] sm:$0xff] }
 0x2d0   : > { %4287 = vst [vmem:[#allocation33_spill] sm:$0xff] %v3254_v18  ;;  %v969_v10 = vmul.f32 %v3254_v18, %v3254_v18 }
 0x2d1   : > { %4286 = vst [vmem:[#allocation32_spill] sm:$0xff] %v3244_v46  ;;  %v962_v17 = vmul.f32 %v3244_v46, %v3244_v46 }
 0x2d2   : > { %997 = vadd.xlane.f32.xlu1 %v952_v8  ;;  %v867_v63 = vpop.xlane.xlu1 %866  ;;  %v2074_v8 = vld [vmem:[#allocation11] sm:$0xff] }
 0x2d3   : > { %1015 = vadd.xlane.f32.xlu2 %v961_v51  ;;  %1017 = vadd.xlane.f32.xlu0 %v962_v17  ;;  %v817_v9 = vpop.xlane.xlu0 %816  ;;  %v906_v11 = vmul.f32 %v3094_v25, %v867_v63 }
 0x2d4   : > { %v881_v54 = vmul.f32 %v3094_v25, %v817_v9  ;;  %v833_v0 = vpop.xlane.xlu2 %832 }
 0x2d5   : > { %v3259_v1 = vsub.f32 %v3075_v12, %v906_v11  ;;  %v889_v55 = vmul.f32 %v3094_v25, %v833_v0 }
 0x2d6   : > { %v3262_v20 = vsub.f32 %v3078_v13, %v881_v54 }
 0x2d7   : > { %4288 = vst [vmem:[#allocation34_spill] sm:$0xff] %v3259_v1  ;;  %v970_v26 = vmul.f32 %v3259_v1, %v3259_v1  ;;  %v3272_v30 = vsub.f32 %v3081_v14, %v889_v55 }
 0x2d8   : > { %4289 = vst [vmem:[#allocation35_spill] sm:$0xff] %v3262_v20  ;;  %v945_v29 = vmul.f32 %v3262_v20, %v3262_v20 }
 0x2d9   : > { %4290 = vst [vmem:[#allocation36_spill] sm:$0xff] %v3272_v30  ;;  %v953_v23 = vmul.f32 %v3272_v30, %v3272_v30 }
 0x2da   : > { %1031 = vadd.xlane.f32.xlu1 %v969_v10  ;;  %v819_v2 = vpop.xlane.xlu1 %818 }
 0x2db   : > { %1033 = vadd.xlane.f32.xlu2 %v970_v26  ;;  %983 = vadd.xlane.f32.xlu0 %v945_v29  ;;  %v835_v12 = vpop.xlane.xlu0 %834  ;;  %v882_v13 = vmul.f32 %v3094_v25, %v819_v2 }
 0x2dc   : > { %v890_v57 = vmul.f32 %v3094_v25, %v835_v12 }
 0x2dd   : > { %v3277_v3 = vsub.f32 %v3087_v15, %v882_v13  ;;  %v2080_v15 = vld [vmem:[#allocation11 + $0x30] sm:$0xff] }
 0x2de   : > { %v3280_v4 = vsub.f32 %v3090_v16, %v890_v57  ;;  %2086 = vmatpush.bf16.msra.mxu2 %v2080_v15  ;;  %2087 = vmatpush.bf16.msra.mxu3 %v2080_v15  ;;  %v2079_v16 = vld [vmem:[#allocation11 + $0x28] sm:$0xff] }
 0x2df   : > { %4291 = vst [vmem:[#allocation37_spill] sm:$0xff] %v3277_v3  ;;  %v946_v58 = vmul.f32 %v3277_v3, %v3277_v3  ;;  %1606 = vmatpush.bf16.msra.mxu0 %v2080_v15  ;;  %2085 = vmatpush.bf16.msra.mxu1 %v2080_v15 }
 0x2e0   : > { %4292 = vst [vmem:[#allocation38_spill] sm:$0xff] %v3280_v4  ;;  %v954_v14 = vmul.f32 %v3280_v4, %v3280_v4 }
 0x2e2   : > { %985 = vadd.xlane.f32.xlu1 %v946_v58  ;;  %2089 = vmatpush.bf16.msra.mxu2 %v2079_v16 }
 0x2e3   : > { %1001 = vadd.xlane.f32.xlu0 %v954_v14  ;;  %999 = vadd.xlane.f32.xlu2 %v953_v23 }
 0x2e4   : > { %2090 = vmatpush.bf16.msra.mxu3 %v2079_v16  ;;  %1607 = vmatpush.bf16.msra.mxu0 %v2079_v16 }
 0x2e5   : > { %2088 = vmatpush.bf16.msra.mxu1 %v2079_v16 }
 0x2e6   : > { %2092 = vmatpush.bf16.msra.mxu2 %v2078_v38 }
 0x2e8   : > { %2093 = vmatpush.bf16.msra.mxu3 %v2078_v38  ;;  %1608 = vmatpush.bf16.msra.mxu0 %v2078_v38 }
 0x2e9   : > { %2091 = vmatpush.bf16.msra.mxu1 %v2078_v38 }
 0x2ea   : > { %2095 = vmatpush.bf16.msra.mxu2 %v2077_v5 }
 0x2ec   : > { %2096 = vmatpush.bf16.msra.mxu3 %v2077_v5  ;;  %1609 = vmatpush.bf16.msra.mxu0 %v2077_v5 }
 0x2ed   : > { %2094 = vmatpush.bf16.msra.mxu1 %v2077_v5 }
 0x2ee   : > { %2098 = vmatpush.bf16.msra.mxu2 %v2076_v42 }
 0x2f0   : > { %2099 = vmatpush.bf16.msra.mxu3 %v2076_v42  ;;  %1610 = vmatpush.bf16.msra.mxu0 %v2076_v42 }
 0x2f1   : > { %2097 = vmatpush.bf16.msra.mxu1 %v2076_v42 }
 0x2f2   : > { %2101 = vmatpush.bf16.msra.mxu2 %v2075_v61 }
 0x2f4   : > { %2102 = vmatpush.bf16.msra.mxu3 %v2075_v61  ;;  %1611 = vmatpush.bf16.msra.mxu0 %v2075_v61 }
 0x2f5   : > { %2100 = vmatpush.bf16.msra.mxu1 %v2075_v61 }
 0x2f6   : > { %2104 = vmatpush.bf16.msra.mxu2 %v2074_v8 }
 0x2f8   : > { %2105 = vmatpush.bf16.msra.mxu3 %v2074_v8  ;;  %1612 = vmatpush.bf16.msra.mxu0 %v2074_v8 }
 0x2f9   : > { %2103 = vmatpush.bf16.msra.mxu1 %v2074_v8 }
 0x304   : > { %v1020_v6 = vpop.xlane.xlu2 %1019 }
 0x305   : > { %v1004_v60 = vpop.xlane.xlu0 %1003  ;;  %v1059_v44 = vmul.f32 %v1020_v6, %v3094_v25 }
 0x306   : > { %v1051_v7 = vmul.f32 %v1004_v60, %v3094_v25 }
 0x307   : > { %v3292_v51 = vadd.f32 1e-05, %v1059_v44 }
 0x308   : > { %v3290_v47 = vadd.f32 1e-05, %v1051_v7 }
 0x309   : > { %vm1345_vm1 = vweird.f32 %v3292_v51 }
 0x30a   : > { %2279 = vrsqrt.f32 %v3290_v47  ;;  %vm1265_vm10 = vweird.f32 %v3290_v47 }
 0x30b   : > { %2281 = vrsqrt.f32 %v3292_v51 }
 0x30c   : > { %v972_v54 = vpop.xlane.xlu2 %971 }
 0x30d   : > { %v1006_v17 = vpop.xlane.xlu1 %1005  ;;  %v1022_v63 = vpop.xlane.xlu0 %1021  ;;  %v1035_v10 = vmul.f32 %v972_v54, %v3094_v25 }
 0x30e   : > { %v1052_v9 = vmul.f32 %v1006_v17, %v3094_v25  ;;  %v1060_v11 = vmul.f32 %v1022_v63, %v3094_v25 }
 0x30f   : > { %v3312_v13 = vadd.f32 1e-05, %v1035_v10 }
 0x310   : > { %v3298_v0 = vpop.eup %2279  ;;  %v3300_v55 = vadd.f32 1e-05, %v1052_v9  ;;  %v3302_v26 = vadd.f32 1e-05, %v1060_v11 }
 0x311   : > { %v1260_v29 = vmul.f32 %v3298_v0, %v3290_v47  ;;  %v3308_v2 = vpop.eup %2281  ;;  %vm1266_vm9 = vweird.f32 %v3298_v0  ;;  %vm1105_vm5 = vweird.f32 %v3312_v13 }
 0x312   : > { %2283 = vrsqrt.f32 %v3300_v55  ;;  %v1340_v58 = vmul.f32 %v3308_v2, %v3292_v51  ;;  %vm3358_vm11 = vmor %vm1265_vm10, %vm1266_vm9  ;;  %vm1346_vm12 = vweird.f32 %v3308_v2  ;;  %vm1275_vm14 = vweird.f32 %v3300_v55 }
 0x313   : > { %2285 = vrsqrt.f32 %v3302_v26  ;;  %v1261_v12 = vmul.f32 %v3298_v0, %v1260_v29  ;;  %vm3408_vm2 = vmor %vm1345_vm1, %vm1346_vm12  ;;  %vm1355_vm3 = vweird.f32 %v3302_v26 }
 0x314   : > { %v990_v15 = vpop.xlane.xlu2 %989  ;;  %2287 = vrsqrt.f32 %v3312_v13  ;;  %v1341_v61 = vmul.f32 %v3308_v2, %v1340_v58 }
 0x315   : > { %v988_v57 = vpop.xlane.xlu1 %987  ;;  %v974_v23 = vpop.xlane.xlu0 %973  ;;  %v1044_v16 = vmul.f32 %v990_v15, %v3094_v25  ;;  %v1262_v5 = vmul.f32 0.5, %v1261_v12 }
 0x316   : > { %v1043_v14 = vmul.f32 %v988_v57, %v3094_v25  ;;  %v1036_v35 = vmul.f32 %v974_v23, %v3094_v25  ;;  %v1342_v12 = vmul.f32 0.5, %v1341_v61 }
 0x317   : > { %v3330_v44 = vadd.f32 1e-05, %v1044_v16  ;;  %v1263_v63 = vsub.f32 1.5, %v1262_v5 }
 0x318   : > { %v3319_v38 = vpop.eup %2283  ;;  %v3322_v42 = vadd.f32 1e-05, %v1043_v14  ;;  %v3324_v60 = vadd.f32 1e-05, %v1036_v35 }
 0x319   : > { %v3326_v6 = vpop.eup %2285  ;;  %v1270_v7 = vmul.f32 %v3319_v38, %v3300_v55  ;;  %v1264_v35 = vmul.f32 %v3298_v0, %v1263_v63  ;;  %vm1276_vm13 = vweird.f32 %v3319_v38  ;;  %v3394_v63 = vld [vmem:[#allocation8] ss:$0 sm:$0xff]  ;;  %vm1195_vm9 = vweird.f32 %v3330_v44 }
 0x31a   : > { %v1350_v8 = vmul.f32 %v3326_v6, %v3302_v26  ;;  %2289 = vrsqrt.f32 %v3322_v42  ;;  %v3340_v29 = vpop.eup %2287  ;;  %vm3380_vm15 = vmor %vm1275_vm14, %vm1276_vm13  ;;  %vm1356_vm0 = vweird.f32 %v3326_v6  ;;  %vm1185_vm7 = vweird.f32 %v3322_v42 }
 0x31b   : > { %v1271_v17 = vmul.f32 %v3319_v38, %v1270_v7  ;;  %2291 = vrsqrt.f32 %v3324_v60  ;;  %v1100_v7 = vmul.f32 %v3340_v29, %v3312_v13  ;;  %vm3418_vm4 = vmor %vm1355_vm3, %vm1356_vm0  ;;  %vm1106_vm6 = vweird.f32 %v3340_v29 }
 0x31c   : > { %v1351_v9 = vmul.f32 %v3326_v6, %v1350_v8  ;;  %2293 = vrsqrt.f32 %v3330_v44  ;;  %vm1115_vm8 = vweird.f32 %v3324_v60  ;;  %vm3485_vm12 = vmor %vm1105_vm5, %vm1106_vm6 }
 0x31d   : > { %v1272_v11 = vmul.f32 0.5, %v1271_v17  ;;  %v1024_v54 = vpop.xlane.xlu0 %1023  ;;  %v1008_v10 = vpop.xlane.xlu1 %1007  ;;  %v1343_v17 = vsub.f32 1.5, %v1342_v12  ;;  %v1268_v12 = vsel %vm3358_vm11, %v3298_v0, %v1264_v35 }
 0x31e   : > { %v1053_v57 = vmul.f32 %v1008_v10, %v3094_v25  ;;  %v1010_v23 = vpop.xlane.xlu2 %1009  ;;  %v1352_v14 = vmul.f32 0.5, %v1351_v9  ;;  %v1061_v61 = vmul.f32 %v1024_v54, %v3094_v25 }
 0x31f   : > { %v1273_v58 = vsub.f32 1.5, %v1272_v11  ;;  %v1054_v16 = vmul.f32 %v1010_v23, %v3094_v25  ;;  %v1344_v4 = vmul.f32 %v3308_v2, %v1343_v17  ;;  %v1435_v17 = vmul.f32 %v1268_v12, %v3102_v22 }
 0x320   : > { %v3345_v15 = vadd.f32 1e-05, %v1053_v57  ;;  %v3348_v5 = vpop.eup %2289  ;;  %v1353_v10 = vsub.f32 1.5, %v1352_v14  ;;  %v1101_v57 = vmul.f32 %v3340_v29, %v1100_v7 }
 0x321   : > { %v3353_v8 = vpop.eup %2291  ;;  %v1274_v11 = vmul.f32 %v3319_v38, %v1273_v58  ;;  %v3368_v47 = vadd.f32 1e-05, %v1054_v16  ;;  %v1180_v23 = vmul.f32 %v3348_v5, %v3322_v42  ;;  %v3377_v58 = vadd.f32 1e-05, %v1061_v61 }
 0x322   : > { %v3356_v9 = vpop.eup %2293  ;;  %v1110_v54 = vmul.f32 %v3353_v8, %v3324_v60  ;;  %2295 = vrsqrt.f32 %v3345_v15  ;;  %v1354_v7 = vmul.f32 %v3326_v6, %v1353_v10  ;;  %v1102_v10 = vmul.f32 0.5, %v1101_v57  ;;  %v3425_v57 = vld [vmem:[#allocation9] ss:$0 sm:$0xff] }
 0x323   : > { %v1190_v0 = vmul.f32 %v3356_v9, %v3330_v44  ;;  %2297 = vrsqrt.f32 %v3368_v47  ;;  %v1278_v61 = vsel %vm3380_vm15, %v3319_v38, %v1274_v11  ;;  %v1181_v18 = vmul.f32 %v3348_v5, %v1180_v23 }
 0x324   : > { %v1111_v3 = vmul.f32 %v3353_v8, %v1110_v54  ;;  %2299 = vrsqrt.f32 %v3377_v58  ;;  %v1436_v51 = vmul.f32 %v1278_v61, %v3118_v41  ;;  %v1470_v12 = vmul.f32 %v3394_v63, %v1435_v17 }
 0x325   : > { %v978_v14 = vpop.xlane.xlu0 %977  ;;  %v1026_v30 = vpop.xlane.xlu1 %1025  ;;  %v1348_v26 = vsel %vm3408_vm2, %v3308_v2, %v1344_v4  ;;  %v1182_v61 = vmul.f32 0.5, %v1181_v18  ;;  %vm1116_vm10 = vweird.f32 %v3353_v8  ;;  %vm1186_vm11 = vweird.f32 %v3348_v5 }
 0x326   : > { %v1038_v55 = vmul.f32 %v978_v14, %v3094_v25  ;;  %v976_v35 = vpop.xlane.xlu2 %975  ;;  %v1062_v1 = vmul.f32 %v1026_v30, %v3094_v25  ;;  %v1191_v30 = vmul.f32 %v3356_v9, %v1190_v0  ;;  %v1112_v41 = vmul.f32 0.5, %v1111_v3  ;;  %vm3494_vm14 = vmor %vm1115_vm8, %vm1116_vm10 }
 0x327   : > { %v1037_v14 = vmul.f32 %v976_v35, %v3094_v25  ;;  %v1103_v35 = vsub.f32 1.5, %v1102_v10  ;;  %v1443_v3 = vmul.f32 %v1348_v26, %v3099_v31  ;;  %v1505_v18 = vadd.f32 %v3425_v57, %v1470_v12  ;;  %vm3506_vm15 = vmor %vm1185_vm7, %vm1186_vm11 }
 0x328   : > { %v3397_v20 = vadd.f32 1e-05, %v1038_v55  ;;  %v3404_v38 = vpop.eup %2295  ;;  %v3432_v16 = vadd.f32 1e-05, %v1062_v1  ;;  %v1358_v55 = vsel %vm3418_vm4, %v3326_v6, %v1354_v7  ;;  %v1192_v2 = vmul.f32 0.5, %v1191_v30 }
 0x329   : > { %v1280_v54 = vmul.f32 %v3404_v38, %v3345_v15  ;;  %v3430_v23 = vpop.eup %2297  ;;  %v3434_v0 = vadd.f32 1e-05, %v1037_v14  ;;  %v1471_v1 = vmul.f32 %v3394_v63, %v1436_v51  ;;  %v1444_v7 = vmul.f32 %v1358_v55, %v3115_v40 }
 0x32a   : > { %2301 = vrsqrt.f32 %v3397_v20  ;;  %v1290_v4 = vmul.f32 %v3430_v23, %v3368_v47  ;;  %v3446_v14 = vpop.eup %2299  ;;  %v1113_v22 = vsub.f32 1.5, %v1112_v41  ;;  %v1478_v30 = vmul.f32 %v3394_v63, %v1443_v3 }
 0x32b   : > { %2303 = vrsqrt.f32 %v3434_v0  ;;  %v1281_v6 = vmul.f32 %v3404_v38, %v1280_v54  ;;  %v1506_v31 = vadd.f32 %v3425_v57, %v1471_v1  ;;  %v1104_v26 = vmul.f32 %v3340_v29, %v1103_v35 }
 0x32c   : > { %2305 = vrsqrt.f32 %v3432_v16  ;;  %v1291_v54 = vmul.f32 %v3430_v23, %v1290_v4  ;;  %v1183_v40 = vsub.f32 1.5, %v1182_v61  ;;  %v1193_v55 = vsub.f32 1.5, %v1192_v2 }
 0x32d   : > { %v1012_v17 = vpop.xlane.xlu0 %1011  ;;  %v992_v51 = vpop.xlane.xlu1 %991  ;;  %v1529_v46 = vpack.c.bf16 %v1506_v31, %v1505_v18  ;;  %v1479_v41 = vmul.f32 %v3394_v63, %v1444_v7  ;;  %v1360_v1 = vmul.f32 %v3446_v14, %v3377_v58  ;;  %v1282_v62 = vmul.f32 0.5, %v1281_v6 }
 0x32e   : > { %v994_v11 = vpop.xlane.xlu2 %993  ;;  %v1055_v12 = vmul.f32 %v1012_v17, %v3094_v25  ;;  %v1045_v35 = vmul.f32 %v992_v51, %v3094_v25  ;;  %v1114_v4 = vmul.f32 %v3353_v8, %v1113_v22  ;;  %v1513_v61 = vadd.f32 %v3425_v57, %v1478_v30 }
 0x32f   : > { %1653 = vmatmul.bf16.vlgmr.msra.gmra.mxu2 %v1529_v46  ;;  %v1514_v2 = vadd.f32 %v3425_v57, %v1479_v41  ;;  %v1292_v17 = vmul.f32 0.5, %v1291_v54  ;;  %v1184_v22 = vmul.f32 %v3348_v5, %v1183_v40  ;;  %v1194_v31 = vmul.f32 %v3356_v9, %v1193_v55 }
 0x330   : > { %v3453_v10 = vpop.eup %2301  ;;  %v3477_v18 = vadd.f32 1e-05, %v1055_v12  ;;  %vm1196_vm13 = vweird.f32 %v3356_v9  ;;  %v1361_v54 = vmul.f32 %v3446_v14, %v1360_v1  ;;  %v1283_v13 = vsub.f32 1.5, %v1282_v62 }
 0x331   : > { %v1130_v3 = vmul.f32 %v3453_v10, %v3397_v20  ;;  %v3468_v43 = vpop.eup %2303  ;;  %v1533_v30 = vpack.c.bf16 %v1514_v2, %v1513_v61  ;;  %v3500_v41 = vadd.f32 1e-05, %v1045_v35  ;;  %vm1285_vm0 = vweird.f32 %v3345_v15  ;;  %vm3521_vm1 = vmor %vm1195_vm9, %vm1196_vm13 }
 0x332   : > { %v1120_v6 = vmul.f32 %v3468_v43, %v3434_v0  ;;  %v3479_v7 = vpop.eup %2305  ;;  %v1046_v55 = vmul.f32 %v994_v11, %v3094_v25  ;;  %v1108_v62 = vsel %vm3485_vm12, %v3340_v29, %v1104_v26  ;;  %v1118_v1 = vsel %vm3494_vm14, %v3353_v8, %v1114_v4 }
 0x333   : > { %v1131_v12 = vmul.f32 %v3453_v10, %v1130_v3  ;;  %1673 = vmatmul.bf16.vlgmr.msra.gmra.mxu3 %v1533_v30  ;;  %v1293_v3 = vsub.f32 1.5, %v1292_v17  ;;  %vm1295_vm2 = vweird.f32 %v3368_v47  ;;  %v1370_v11 = vmul.f32 %v3479_v7, %v3432_v16 }
 0x334   : > { %v1121_v60 = vmul.f32 %v3468_v43, %v1120_v6  ;;  %2307 = vrsqrt.f32 %v3477_v18  ;;  %v1419_v29 = vmul.f32 %v1108_v62, %v3112_v39  ;;  %v3530_v35 = vadd.f32 1e-05, %v1046_v55 }
 0x335   : > { %v1030_v26 = vpop.xlane.xlu0 %1029  ;;  %v1420_v8 = vmul.f32 %v1118_v1, %v3128_v48  ;;  %v1188_v44 = vsel %vm3506_vm15, %v3348_v5, %v1184_v22  ;;  %v1198_v4 = vsel %vm3521_vm1, %v3356_v9, %v1194_v31  ;;  %v1014_v61 = vpop.xlane.xlu1 %1013  ;;  %v1132_v17 = vmul.f32 0.5, %v1131_v12 }
 0x336   : > { %v1028_v2 = vpop.xlane.xlu2 %1027  ;;  %2309 = vrsqrt.f32 %v3500_v41  ;;  %v1454_v39 = vmul.f32 %v3394_v63, %v1419_v29  ;;  %v1427_v6 = vmul.f32 %v1188_v44, %v3136_v53  ;;  %v1122_v46 = vmul.f32 0.5, %v1121_v60 }
 0x337   : > { %2311 = vrsqrt.f32 %v3530_v35  ;;  %v1455_v48 = vmul.f32 %v3394_v63, %v1420_v8  ;;  %v1428_v5 = vmul.f32 %v1198_v4, %v3133_v52  ;;  %v1284_v22 = vmul.f32 %v3404_v38, %v1283_v13 }
 0x338   : > { %vm1286_vm3 = vweird.f32 %v3404_v38  ;;  %v1294_v9 = vmul.f32 %v3430_v23, %v1293_v3  ;;  %vm1296_vm4 = vweird.f32 %v3430_v23  ;;  %vm1135_vm5 = vweird.f32 %v3397_v20 }
 0x339   : > { %v1371_v31 = vmul.f32 %v3479_v7, %v1370_v11  ;;  %v1489_v53 = vadd.f32 %v3425_v57, %v1454_v39  ;;  %v1490_v30 = vadd.f32 %v3425_v57, %v1455_v48  ;;  %v1462_v51 = vmul.f32 %v3394_v63, %v1427_v6  ;;  %vm3567_vm6 = vmor %vm1285_vm0, %vm1286_vm3 }
 0x33a   : > { %v3554_v12 = vpop.eup %2307  ;;  %v1133_v52 = vsub.f32 1.5, %v1132_v17  ;;  %v1463_v13 = vmul.f32 %v3394_v63, %v1428_v5  ;;  %v1064_v40 = vmul.f32 %v1030_v26, %v3094_v25  ;;  %v1056_v60 = vmul.f32 %v1014_v61, %v3094_v25  ;;  %vm3582_vm7 = vmor %vm1295_vm2, %vm1296_vm4 }
 0x33b   : > { %v1123_v55 = vsub.f32 1.5, %v1122_v46  ;;  %v1521_v62 = vpack.c.bf16 %v1490_v30, %v1489_v53  ;;  %v1497_v1 = vadd.f32 %v3425_v57, %v1462_v51  ;;  %v1063_v42 = vmul.f32 %v1028_v2, %v3094_v25 }
 0x33c   : > { %v3561_v3 = vpop.eup %2309  ;;  %v1362_v11 = vmul.f32 0.5, %v1361_v54  ;;  %v1498_v26 = vadd.f32 %v3425_v57, %v1463_v13  ;;  %v3572_v8 = vadd.f32 1e-05, %v1064_v40  ;;  %v3574_v44 = vadd.f32 1e-05, %v1056_v60 }
 0x33d   : > { %v3576_v4 = vpop.eup %2311  ;;  %vm1136_vm8 = vweird.f32 %v3453_v10  ;;  %v1372_v15 = vmul.f32 0.5, %v1371_v31  ;;  %vm1125_vm9 = vweird.f32 %v3434_v0  ;;  %1613 = vmatmul.bf16.vlgmr.msra.gmra.mxu0 %v1521_v62  ;;  %v3588_v61 = vadd.f32 1e-05, %v1063_v42  ;;  %v996_v6 = vpop.xlane.xlu0 %995 }
 0x33e   : > { %vm1366_vm10 = vweird.f32 %v3446_v14  ;;  %v1300_v2 = vmul.f32 %v3554_v12, %v3477_v18  ;;  %v1525_v17 = vpack.c.bf16 %v1498_v26, %v1497_v1  ;;  %v1288_v47 = vsel %vm3567_vm6, %v3404_v38, %v1284_v22  ;;  %v980_v5 = vpop.xlane.xlu1 %979  ;;  %v982_v31 = vpop.xlane.xlu2 %981  ;;  %vm3613_vm13 = vmor %vm1135_vm5, %vm1136_vm8 }
 0x33f   : > { %v1298_v39 = vsel %vm3582_vm7, %v3430_v23, %v1294_v9  ;;  %v1134_v46 = vmul.f32 %v3453_v10, %v1133_v52  ;;  %v1124_v48 = vmul.f32 %v3468_v43, %v1123_v55  ;;  %vm1126_vm11 = vweird.f32 %v3468_v43 }
 0x340   : > { %2313 = vrsqrt.f32 %v3572_v8  ;;  %v1363_v53 = vsub.f32 1.5, %v1362_v11  ;;  %vm1365_vm12 = vweird.f32 %v3377_v58  ;;  %v1200_v38 = vmul.f32 %v3561_v3, %v3500_v41  ;;  %1633 = vmatmul.bf16.vlgmr.msra.gmra.mxu1 %v1525_v17  ;;  %vm3624_vm14 = vmor %vm1125_vm9, %vm1126_vm11 }
 0x341   : > { %v1210_v23 = vmul.f32 %v3576_v4, %v3530_v35  ;;  %2315 = vrsqrt.f32 %v3574_v44  ;;  %v1373_v9 = vsub.f32 1.5, %v1372_v15  ;;  %v1437_v30 = vmul.f32 %v1288_v47, %v3146_v21  ;;  %vm3671_vm0 = vmor %vm1365_vm12, %vm1366_vm10 }
 0x342   : > { %2317 = vrsqrt.f32 %v3588_v61  ;;  %v1438_v51 = vmul.f32 %v1298_v39, %v3154_v28  ;;  %v1301_v20 = vmul.f32 %v3554_v12, %v1300_v2  ;;  %v1047_v13 = vmul.f32 %v996_v6, %v3094_v25 }
 0x343   : > { %v1039_v40 = vmul.f32 %v980_v5, %v3094_v25  ;;  %v1040_v60 = vmul.f32 %v982_v31, %v3094_v25  ;;  %v1472_v21 = vmul.f32 %v3394_v63, %v1437_v30  ;;  %v1128_v0 = vsel %vm3624_vm14, %v3468_v43, %v1124_v48 }
 0x344   : > { %v1473_v28 = vmul.f32 %v3394_v63, %v1438_v51  ;;  %v1138_v55 = vsel %vm3613_vm13, %v3453_v10, %v1134_v46  ;;  %v1201_v62 = vmul.f32 %v3561_v3, %v1200_v38  ;;  %v1211_v1 = vmul.f32 %v3576_v4, %v1210_v23 }
 0x345   : > { %v3642_v42 = vadd.f32 1e-05, %v1047_v13  ;;  %v3644_v11 = vadd.f32 1e-05, %v1039_v40  ;;  %v1364_v26 = vmul.f32 %v3446_v14, %v1363_v53  ;;  %v1507_v54 = vadd.f32 %v3425_v57, %v1472_v21 }
 0x346   : > { %v3646_v29 = vpop.eup %2313  ;;  %v1508_v43 = vadd.f32 %v3425_v57, %v1473_v28  ;;  %v3651_v15 = vadd.f32 1e-05, %v1040_v60  ;;  %vm1376_vm15 = vweird.f32 %v3479_v7  ;;  %v1421_v10 = vmul.f32 %v1128_v0, %v3172_v37  ;;  %v1016_v0 = vpop.xlane.xlu2 %1015 }
 0x347   : > { %v3653_v2 = vpop.eup %2315  ;;  %2319 = vrsqrt.f32 %v3642_v42  ;;  %v1422_v17 = vmul.f32 %v1138_v55, %v3169_v36  ;;  %v1374_v39 = vmul.f32 %v3479_v7, %v1373_v9  ;;  %v1302_v6 = vmul.f32 0.5, %v1301_v20  ;;  %v998_v9 = vpop.xlane.xlu1 %997 }
 0x348   : > { %v3659_v47 = vpop.eup %2317  ;;  %v1310_v46 = vmul.f32 %v3653_v2, %v3574_v44  ;;  %v1530_v48 = vpack.c.bf16 %v1508_v43, %v1507_v54  ;;  %v1202_v5 = vmul.f32 0.5, %v1201_v62  ;;  %v1212_v31 = vmul.f32 0.5, %v1211_v1  ;;  %v1018_v20 = vpop.xlane.xlu0 %1017 }
 0x349   : > { %v1380_v53 = vmul.f32 %v3659_v47, %v3588_v61  ;;  %2321 = vrsqrt.f32 %v3644_v11  ;;  %vm1375_vm1 = vweird.f32 %v3432_v16  ;;  %v1390_v37 = vmul.f32 %v3646_v29, %v3572_v8 }
 0x34a   : > { %1658 = vmatmul.bf16.gmra.mxu2 %v1530_v48  ;;  %2323 = vrsqrt.f32 %v3651_v15  ;;  %vm3681_vm2 = vmor %vm1375_vm1, %vm1376_vm15  ;;  %v1311_v58 = vmul.f32 %v3653_v2, %v1310_v46  ;;  %v1456_v23 = vmul.f32 %v3394_v63, %v1421_v10  ;;  %v1457_v22 = vmul.f32 %v3394_v63, %v1422_v17 }
 0x34b   : > { %v1303_v16 = vsub.f32 1.5, %v1302_v6  ;;  %vm1205_vm3 = vweird.f32 %v3500_v41  ;;  %v1381_v30 = vmul.f32 %v3659_v47, %v1380_v53  ;;  %v1368_v51 = vsel %vm3671_vm0, %v3446_v14, %v1364_v26 }
 0x34c   : > { %v1378_v52 = vsel %vm3681_vm2, %v3479_v7, %v1374_v39  ;;  %v1203_v40 = vsub.f32 1.5, %v1202_v5  ;;  %v1213_v60 = vsub.f32 1.5, %v1212_v31  ;;  %v1491_v21 = vadd.f32 %v3425_v57, %v1456_v23 }
 0x34d   : > { %v3696_v13 = vpop.eup %2319  ;;  %v1492_v28 = vadd.f32 %v3425_v57, %v1457_v22  ;;  %vm1306_vm4 = vweird.f32 %v3554_v12  ;;  %vm1215_vm5 = vweird.f32 %v3530_v35  ;;  %v1391_v14 = vmul.f32 %v3646_v29, %v1390_v37 }
 0x34e   : > { %v1220_v55 = vmul.f32 %v3696_v13, %v3642_v42  ;;  %v1445_v7 = vmul.f32 %v1368_v51, %v3151_v27  ;;  %v1048_v62 = vmul.f32 %v998_v9, %v3094_v25  ;;  %vm1206_vm6 = vweird.f32 %v3561_v3 }
 0x34f   : > { %v3707_v1 = vpop.eup %2321  ;;  %v1312_v26 = vmul.f32 0.5, %v1311_v58  ;;  %v1522_v54 = vpack.c.bf16 %v1492_v28, %v1491_v21  ;;  %v1446_v43 = vmul.f32 %v1378_v52, %v3164_v33  ;;  %v3714_v17 = vmul.f32 %v3554_v12, %v1303_v16  ;;  %vm3742_vm10 = vmor %vm1205_vm3, %vm1206_vm6  ;;  %v1032_v21 = vpop.xlane.xlu1 %1031 }
 0x350   : > { %v3711_v10 = vpop.eup %2323  ;;  %vm1305_vm7 = vweird.f32 %v3477_v18  ;;  %vm1216_vm8 = vweird.f32 %v3576_v4  ;;  %v1382_v27 = vmul.f32 0.5, %v1381_v30  ;;  %v1140_v39 = vmul.f32 %v3707_v1, %v3644_v11  ;;  %v984_v28 = vpop.xlane.xlu0 %983 }
 0x351   : > { %v1204_v6 = vmul.f32 %v3561_v3, %v1203_v40  ;;  %v1214_v46 = vmul.f32 %v3576_v4, %v1213_v60  ;;  %v1221_v48 = vmul.f32 %v3696_v13, %v1220_v55  ;;  %1618 = vmatmul.bf16.gmra.mxu0 %v1522_v54  ;;  %v1480_v33 = vmul.f32 %v3394_v63, %v1445_v7  ;;  %vm1217_vm14 = vmor %vm1215_vm5, %vm1216_vm8  ;;  %v1034_v7 = vpop.xlane.xlu2 %1033 }
 0x352   : > { %v3724_v5 = vmul.f32 0.5, %v1391_v14  ;;  %vm1315_vm9 = vweird.f32 %v3574_v44  ;;  %v1150_v31 = vmul.f32 %v3711_v10, %v3651_v15  ;;  %v1481_v53 = vmul.f32 %v3394_v63, %v1446_v43  ;;  %vm3774_vm1 = vmor %vm1305_vm7, %vm1306_vm4 }
 0x353   : > { %v3730_v36 = vadd.f32 1e-05, %v1048_v62  ;;  %v1313_v37 = vsub.f32 1.5, %v1312_v26  ;;  %v1141_v38 = vmul.f32 %v3707_v1, %v1140_v39  ;;  %v1058_v58 = vmul.f32 %v1018_v20, %v3094_v25 }
 0x354   : > { %v1057_v23 = vmul.f32 %v1016_v0, %v3094_v25  ;;  %v1383_v22 = vsub.f32 1.5, %v1382_v27  ;;  %v1515_v9 = vadd.f32 %v3425_v57, %v1480_v33  ;;  %v1516_v16 = vadd.f32 %v3425_v57, %v1481_v53 }
 0x355   : > { %2325 = vrsqrt.f32 %v3730_v36  ;;  %vm1316_vm11 = vweird.f32 %v3653_v2  ;;  %v1222_v51 = vmul.f32 0.5, %v1221_v48  ;;  %v3747_v52 = vadd.f32 1e-05, %v1058_v58 }
 0x356   : > { %v3749_v20 = vadd.f32 1e-05, %v1057_v23  ;;  %vm1396_vm12 = vweird.f32 %v3646_v29  ;;  %vm1386_vm13 = vweird.f32 %v3659_v47  ;;  %v1151_v40 = vmul.f32 %v3711_v10, %v1150_v31  ;;  %vm3793_vm2 = vmor %vm1315_vm9, %vm1316_vm11 }
 0x357   : > { %v1534_v60 = vpack.c.bf16 %v1516_v16, %v1515_v9  ;;  %v1208_v41 = vsel %vm3742_vm10, %v3561_v3, %v1204_v6  ;;  %v1393_v0 = vsub.f32 1.5, %v3724_v5  ;;  %v1314_v14 = vmul.f32 %v3653_v2, %v1313_v37 }
 0x358   : > { %vm1385_vm15 = vweird.f32 %v3588_v61  ;;  %v1142_v55 = vmul.f32 0.5, %v1141_v38  ;;  %2327 = vrsqrt.f32 %v3747_v52  ;;  %vm1395_vm0 = vweird.f32 %v3572_v8 }
 0x359   : > { %v1384_v3 = vmul.f32 %v3659_v47, %v1383_v22  ;;  %1678 = vmatmul.bf16.gmra.mxu3 %v1534_v60  ;;  %2329 = vrsqrt.f32 %v3749_v20  ;;  %v1218_v35 = vsel %vm1217_vm14, %v3576_v4, %v1214_v46  ;;  %v1429_v62 = vmul.f32 %v1208_v41, %v3182_v45  ;;  %vm3829_vm4 = vmor %vm1385_vm15, %vm1386_vm13 }
 0x35a   : > { %v1223_v54 = vsub.f32 1.5, %v1222_v51  ;;  %v1430_v43 = vmul.f32 %v1218_v35, %v3190_v50  ;;  %v1065_v27 = vmul.f32 %v1032_v21, %v3094_v25  ;;  %v1041_v39 = vmul.f32 %v984_v28, %v3094_v25  ;;  %vm3844_vm6 = vmor %vm1395_vm0, %vm1396_vm12 }
 0x35b   : > { %v3781_v6 = vpop.eup %2325  ;;  %v1152_v4 = vmul.f32 0.5, %v1151_v40  ;;  %v1464_v45 = vmul.f32 %v3394_v63, %v1429_v62  ;;  %v1066_v46 = vmul.f32 %v1034_v7, %v3094_v25  ;;  %v1308_v18 = vsel %vm3774_vm1, %v3554_v12, %v3714_v17 }
 0x35c   : > { %v1143_v48 = vsub.f32 1.5, %v1142_v55  ;;  %v1230_v33 = vmul.f32 %v3781_v6, %v3730_v36  ;;  %v1465_v5 = vmul.f32 %v3394_v63, %v1430_v43  ;;  %v3800_v31 = vadd.f32 1e-05, %v1065_v27 }
 0x35d   : > { %v1499_v53 = vadd.f32 %v3425_v57, %v1464_v45  ;;  %v3803_v37 = vadd.f32 1e-05, %v1041_v39  ;;  %v3805_v12 = vadd.f32 1e-05, %v1066_v46  ;;  %v1318_v44 = vsel %vm3793_vm2, %v3653_v2, %v1314_v14 }
 0x35e   : > { %v3810_v17 = vpop.eup %2327  ;;  %v1231_v38 = vmul.f32 %v3781_v6, %v1230_v33  ;;  %v1500_v58 = vadd.f32 %v3425_v57, %v1465_v5  ;;  %2331 = vrsqrt.f32 %v3800_v31  ;;  %v1439_v23 = vmul.f32 %v1308_v18, %v3187_v49  ;;  %v1002_v33 = vpop.xlane.xlu0 %1001 }
 0x35f   : > { %v3816_v22 = vpop.eup %2329  ;;  %v1394_v9 = vmul.f32 %v3646_v29, %v1393_v0  ;;  %v1153_v16 = vsub.f32 1.5, %v1152_v4  ;;  %v1330_v30 = vmul.f32 %v3810_v17, %v3747_v52  ;;  %2333 = vrsqrt.f32 %v3803_v37  ;;  %v986_v4 = vpop.xlane.xlu1 %985 }
 0x360   : > { %vm1146_vm3 = vweird.f32 %v3707_v1  ;;  %v1232_v2 = vmul.f32 0.5, %v1231_v38  ;;  %v1320_v51 = vmul.f32 %v3816_v22, %v3749_v20  ;;  %v1526_v40 = vpack.c.bf16 %v1500_v58, %v1499_v53  ;;  %v1000_v5 = vpop.xlane.xlu2 %999 }
 0x361   : > { %v3834_v60 = vmul.f32 %v3696_v13, %v1223_v54  ;;  %vm1156_vm5 = vweird.f32 %v3711_v10  ;;  %v1331_v41 = vmul.f32 %v3810_v17, %v1330_v30  ;;  %2335 = vrsqrt.f32 %v3805_v12 }
 0x362   : > { %v1440_v21 = vmul.f32 %v1318_v44, %v3200_v19  ;;  %vm1226_vm7 = vweird.f32 %v3696_v13  ;;  %v3850_v28 = vmul.f32 %v3707_v1, %v1143_v48  ;;  %vm1145_vm8 = vweird.f32 %v3644_v11  ;;  %1638 = vmatmul.bf16.gmra.mxu1 %v1526_v40 }
 0x363   : > { %v1321_v0 = vmul.f32 %v3816_v22, %v1320_v51  ;;  %v1474_v19 = vmul.f32 %v3394_v63, %v1439_v23  ;;  %v1388_v8 = vsel %vm3829_vm4, %v3659_v47, %v1384_v3  ;;  %v3859_v14 = vmul.f32 %v3711_v10, %v1153_v16  ;;  %vm3905_vm2 = vmor %vm1145_vm8, %vm1146_vm3 }
 0x364   : > { %vm1155_vm9 = vweird.f32 %v3651_v15  ;;  %v1475_v55 = vmul.f32 %v3394_v63, %v1440_v21  ;;  %v1398_v7 = vsel %vm3844_vm6, %v3646_v29, %v1394_v9  ;;  %v1447_v35 = vmul.f32 %v1388_v8, %v3208_v24  ;;  %v3867_v62 = vpop.eup %2331 }
 0x365   : > { %vm1225_vm10 = vweird.f32 %v3642_v42  ;;  %v1233_v26 = vsub.f32 1.5, %v1232_v2  ;;  %v1332_v54 = vmul.f32 0.5, %v1331_v41  ;;  %v1322_v47 = vmul.f32 0.5, %v1321_v0  ;;  %v3871_v43 = vpop.eup %2333  ;;  %vm3917_vm6 = vmor %vm1155_vm9, %vm1156_vm5 }
 0x366   : > { %v1448_v3 = vmul.f32 %v1398_v7, %v3205_v56  ;;  %vm1235_vm11 = vweird.f32 %v3730_v36  ;;  %vm1236_vm12 = vweird.f32 %v3781_v6  ;;  %v1400_v29 = vmul.f32 %v3867_v62, %v3800_v31  ;;  %vm3933_vm3 = vmor %vm1225_vm10, %vm1226_vm7 }
 0x367   : > { %v1509_v24 = vadd.f32 %v3425_v57, %v1474_v19  ;;  %v1510_v27 = vadd.f32 %v3425_v57, %v1475_v55  ;;  %vm1336_vm13 = vweird.f32 %v3810_v17  ;;  %vm1325_vm14 = vweird.f32 %v3749_v20  ;;  %v3885_v45 = vpop.eup %2335  ;;  %vm3948_vm7 = vmor %vm1235_vm11, %vm1236_vm12 }
 0x368   : > { %vm1326_vm15 = vweird.f32 %v3816_v22  ;;  %v1160_v56 = vmul.f32 %v3871_v43, %v3803_v37  ;;  %v1482_v39 = vmul.f32 %v3394_v63, %v1447_v35  ;;  %v1323_v46 = vsub.f32 1.5, %v1322_v47 }
 0x369   : > { %v1401_v18 = vmul.f32 %v3867_v62, %v1400_v29  ;;  %v1531_v50 = vpack.c.bf16 %v1510_v27, %v1509_v24  ;;  %v1483_v48 = vmul.f32 %v3394_v63, %v1448_v3  ;;  %v1234_v53 = vmul.f32 %v3781_v6, %v1233_v26  ;;  %vm3958_vm9 = vmor %vm1325_vm14, %vm1326_vm15  ;;  %v4343_v24 = vld [vmem:[#allocation30_spill] sm:$0xff] }
 0x36a   : > { %v1333_v44 = vsub.f32 1.5, %v1332_v54  ;;  %vm1335_vm0 = vweird.f32 %v3747_v52  ;;  %v1161_v38 = vmul.f32 %v3871_v43, %v1160_v56  ;;  %v1410_v58 = vmul.f32 %v3885_v45, %v3805_v12 }
 0x36b   : > { %v1402_v23 = vmul.f32 0.5, %v1401_v18  ;;  %1663 = vmatmul.bf16.gmra.mxu2 %v1531_v50  ;;  %v1517_v9 = vadd.f32 %v3425_v57, %v1482_v39  ;;  %v1518_v16 = vadd.f32 %v3425_v57, %v1483_v48  ;;  %v1042_v30 = vmul.f32 %v986_v4, %v3094_v25  ;;  %vm3982_vm11 = vmor %vm1335_vm0, %vm1336_vm13  ;;  %v4071_v48 = vld [vmem:[%s4358_s21] ss:$0 sm:$0xff] }
 0x36c   : > { %vm1405_vm1 = vweird.f32 %v3800_v31  ;;  %v1162_v2 = vmul.f32 0.5, %v1161_v38  ;;  %v1411_v51 = vmul.f32 %v3885_v45, %v1410_v58  ;;  %v1050_v40 = vmul.f32 %v1002_v33, %v3094_v25  ;;  %v4349_v33 = vld [vmem:[#allocation32_spill] sm:$0xff] }
 0x36d   : > { %v1049_v49 = vmul.f32 %v1000_v5, %v3094_v25  ;;  %v1324_v21 = vmul.f32 %v3816_v22, %v1323_v46  ;;  %v1403_v61 = vsub.f32 1.5, %v1402_v23  ;;  %vm1415_vm4 = vweird.f32 %v3805_v12  ;;  %v4353_v25 = vld [vmem:[#allocation34_spill] sm:$0xff] }
 0x36e   : > { %v1535_v0 = vpack.c.bf16 %v1518_v16, %v1517_v9  ;;  %v3911_v19 = vadd.f32 1e-05, %v1042_v30  ;;  %v1412_v11 = vmul.f32 0.5, %v1411_v51  ;;  %v3921_v8 = vadd.f32 1e-05, %v1050_v40 }
 0x36f   : > { %v3923_v55 = vadd.f32 1e-05, %v1049_v49  ;;  %v1148_v7 = vsel %vm3905_vm2, %v3707_v1, %v3850_v28  ;;  %v1334_v35 = vmul.f32 %v3810_v17, %v1333_v44  ;;  %vm1406_vm5 = vweird.f32 %v3867_v62  ;;  %v4350_v49 = vld [vmem:[#allocation33_spill] sm:$0xff] }
 0x370   : > { %1683 = vmatmul.bf16.gmra.mxu3 %v1535_v0  ;;  %2337 = vrsqrt.f32 %v3911_v19  ;;  %v1158_v1 = vsel %vm3917_vm6, %v3711_v10, %v3859_v14  ;;  %v1163_v28 = vsub.f32 1.5, %v1162_v2  ;;  %v1413_v26 = vsub.f32 1.5, %v1412_v11  ;;  %vm4000_vm13 = vmor %vm1405_vm1, %vm1406_vm5 }
 0x371   : > { %vm1416_vm8 = vweird.f32 %v3885_v45  ;;  %2339 = vrsqrt.f32 %v3921_v8  ;;  %v1404_v36 = vmul.f32 %v3867_v62, %v1403_v61  ;;  %vm1165_vm10 = vweird.f32 %v3803_v37 }
 0x372   : > { %2341 = vrsqrt.f32 %v3923_v55  ;;  %v1423_v14 = vmul.f32 %v1148_v7, %v3218_v32  ;;  %v1424_v54 = vmul.f32 %v1158_v1, %v3226_v34  ;;  %v1414_v47 = vmul.f32 %v3885_v45, %v1413_v26  ;;  %vm4012_vm14 = vmor %vm1415_vm4, %vm1416_vm8 }
 0x373   : > { %v1228_v20 = vsel %vm3933_vm3, %v3696_v13, %v3834_v60  ;;  %v1238_v3 = vsel %vm3948_vm7, %v3781_v6, %v1234_v53  ;;  %v1328_v29 = vsel %vm3958_vm9, %v3816_v22, %v1324_v21  ;;  %v1164_v27 = vmul.f32 %v3871_v43, %v1163_v28  ;;  %v4344_v22 = vld [vmem:[#allocation31_spill] sm:$0xff] }
 0x374   : > { %v1458_v34 = vmul.f32 %v3394_v63, %v1423_v14  ;;  %v1459_v13 = vmul.f32 %v3394_v63, %v1424_v54  ;;  %v1431_v60 = vmul.f32 %v1228_v20, %v3223_v59  ;;  %v1432_v6 = vmul.f32 %v1238_v3, %v4343_v24  ;;  %v4354_v14 = vld [vmem:[#allocation35_spill] sm:$0xff] }
 0x375   : > { %vm1166_vm12 = vweird.f32 %v3871_v43  ;;  %v1338_v52 = vsel %vm3982_vm11, %v3810_v17, %v1334_v35  ;;  %v1441_v56 = vmul.f32 %v1328_v29, %v4344_v22  ;;  %vm1175_vm15 = vweird.f32 %v3911_v19  ;;  %v4357_v22 = vld [vmem:[#allocation36_spill] sm:$0xff] }
 0x376   : > { %v2338_v39 = vpop.eup %2337  ;;  %v1493_v59 = vadd.f32 %v3425_v57, %v1458_v34  ;;  %v1494_v46 = vadd.f32 %v3425_v57, %v1459_v13  ;;  %v1466_v18 = vmul.f32 %v3394_v63, %v1431_v60  ;;  %v1467_v50 = vmul.f32 %v3394_v63, %v1432_v6  ;;  %vm4037_vm1 = vmor %vm1165_vm10, %vm1166_vm12  ;;  %v4355_v13 = vld [vmem:[#allocation37_spill] sm:$0xff] }
 0x377   : > { %v2340_v17 = vpop.eup %2339  ;;  %v1170_v31 = vmul.f32 %v2338_v39, %v3911_v19  ;;  %v1442_v5 = vmul.f32 %v1338_v52, %v4349_v33  ;;  %v1476_v53 = vmul.f32 %v3394_v63, %v1441_v56  ;;  %v1408_v44 = vsel %vm4000_vm13, %v3867_v62, %v1404_v36 }
 0x378   : > { %v2342_v38 = vpop.eup %2341  ;;  %vm1176_vm0 = vweird.f32 %v2338_v39  ;;  %v1250_v12 = vmul.f32 %v2340_v17, %v3921_v8  ;;  %v1523_v58 = vpack.c.bf16 %v1494_v46, %v1493_v59  ;;  %v1418_v23 = vsel %vm4012_vm14, %v3885_v45, %v1414_v47 }
 0x379   : > { %v1171_v9 = vmul.f32 %v2338_v39, %v1170_v31  ;;  %v1240_v16 = vmul.f32 %v2342_v38, %v3923_v55  ;;  %v1501_v30 = vadd.f32 %v3425_v57, %v1466_v18  ;;  %v1502_v2 = vadd.f32 %v3425_v57, %v1467_v50  ;;  %vm1177_vm6 = vmor %vm1175_vm15, %vm1176_vm0  ;;  %v4073_v31 = vld [vmem:[#allocation2] ss:$0 sm:$0xff] }
 0x37a   : > { %v1251_v51 = vmul.f32 %v2340_v17, %v1250_v12  ;;  %1623 = vmatmul.bf16.gmra.mxu0 %v1523_v58  ;;  %v1477_v62 = vmul.f32 %v3394_v63, %v1442_v5  ;;  %v1511_v40 = vadd.f32 %v3425_v57, %v1476_v53  ;;  %v1449_v41 = vmul.f32 %v1408_v44, %v4350_v49 }
 0x37b   : > { %v1172_v21 = vmul.f32 0.5, %v1171_v9  ;;  %v1241_v61 = vmul.f32 %v2342_v38, %v1240_v16  ;;  %v1527_v0 = vpack.c.bf16 %v1502_v2, %v1501_v30  ;;  %v1450_v11 = vmul.f32 %v1418_v23, %v4353_v25 }
 0x37c   : > { %v1252_v7 = vmul.f32 0.5, %v1251_v51  ;;  %v1512_v15 = vadd.f32 %v3425_v57, %v1477_v62  ;;  %v1484_v35 = vmul.f32 %v3394_v63, %v1449_v41  ;;  %v1168_v1 = vsel %vm4037_vm1, %v3871_v43, %v1164_v27  ;;  %v4356_v27 = vld [vmem:[#allocation38_spill] sm:$0xff] }
 0x37d   : > { %v1173_v42 = vsub.f32 1.5, %v1172_v21  ;;  %vm1256_vm2 = vweird.f32 %v2340_v17  ;;  %v1242_v37 = vmul.f32 0.5, %v1241_v61  ;;  %1643 = vmatmul.bf16.gmra.mxu1 %v1527_v0  ;;  %v1485_v28 = vmul.f32 %v3394_v63, %v1450_v11 }
 0x37e   : > { %v1253_v26 = vsub.f32 1.5, %v1252_v7  ;;  %v1532_v10 = vpack.c.bf16 %v1512_v15, %v1511_v40  ;;  %v1519_v36 = vadd.f32 %v3425_v57, %v1484_v35  ;;  %v1425_v54 = vmul.f32 %v1168_v1, %v4354_v14 }
 0x37f   : > { %v1174_v47 = vmul.f32 %v2338_v39, %v1173_v42  ;;  %v1243_v20 = vsub.f32 1.5, %v1242_v37  ;;  %vm1246_vm4 = vweird.f32 %v2342_v38  ;;  %v1520_v3 = vadd.f32 %v3425_v57, %v1485_v28 }
 0x380   : > { %v1254_v43 = vmul.f32 %v2340_v17, %v1253_v26  ;;  %vm1255_vm3 = vweird.f32 %v3921_v8  ;;  %1668 = vmatmul.bf16.gmra.mxu2 %v1532_v10  ;;  %vm1245_vm7 = vweird.f32 %v3923_v55  ;;  %v1460_v24 = vmul.f32 %v3394_v63, %v1425_v54 }
 0x381   : > { %vm1257_vm5 = vmor %vm1255_vm3, %vm1256_vm2  ;;  %v1244_v29 = vmul.f32 %v2342_v38, %v1243_v20  ;;  %v1536_v32 = vpack.c.bf16 %v1520_v3, %v1519_v36  ;;  %v1178_v34 = vsel %vm1177_vm6, %v2338_v39, %v1174_v47 }
 0x382   : > { %vm1247_vm8 = vmor %vm1245_vm7, %vm1246_vm4  ;;  %v1426_v60 = vmul.f32 %v1178_v34, %v4355_v13  ;;  %v1258_v6 = vsel %vm1257_vm5, %v2340_v17, %v1254_v43  ;;  %v1495_v55 = vadd.f32 %v3425_v57, %v1460_v24 }
 0x383   : > { %1688 = vmatmul.bf16.gmra.mxu3 %v1536_v32  ;;  %v1248_v19 = vsel %vm1247_vm8, %v2342_v38, %v1244_v29  ;;  %v1434_v52 = vmul.f32 %v1258_v6, %v4356_v27 }
 0x384   : > { %v1461_v8 = vmul.f32 %v3394_v63, %v1426_v60  ;;  %v1433_v56 = vmul.f32 %v1248_v19, %v4357_v22 }
 0x385   : > { %v1469_v4 = vmul.f32 %v3394_v63, %v1434_v52 }
 0x386   : > { %v1496_v39 = vadd.f32 %v3425_v57, %v1461_v8  ;;  %v1468_v59 = vmul.f32 %v3394_v63, %v1433_v56 }
 0x387   : > { %v1504_v46 = vadd.f32 %v3425_v57, %v1469_v4 }
 0x388   : > { %v1524_v18 = vpack.c.bf16 %v1496_v39, %v1495_v55  ;;  %v1503_v50 = vadd.f32 %v3425_v57, %v1468_v59 }
 0x38a   : > { %1628 = vmatmul.bf16.gmra.mxu0 %v1524_v18  ;;  %v1528_v17 = vpack.c.bf16 %v1504_v46, %v1503_v50 }
 0x38d   : > { %1648 = vmatmul.bf16.gmra.mxu1 %v1528_v17 }
 0x3b2   : > { %v1654_v33 = vpop.f32.mrf.mxu2 }
 0x3b3   : > { %v1655_v5 = vadd.f32 %v4071_v48, %v1654_v33 }
 0x3b5   : > { %v1714_v63 = vadd.f32 %v4073_v31, %v1655_v5 }
 0x3b6   : > { %v1674_v53 = vpop.f32.mrf.mxu3 }
 0x3b7   : > { %1746 = vst [vmem:[%s2934_s25 + $0x80] sm:$0xff] %v1714_v63  ;;  %v1675_v57 = vadd.f32 %v4071_v48, %v1674_v53 }
 0x3b9   : > { %v1722_v44 = vadd.f32 %v4073_v31, %v1675_v57 }
 0x3ba   : > { %v1614_v38 = vpop.f32.mrf.mxu0  ;;  %v1656_v12 = vpop.f32.mrf.mxu2 }
 0x3bb   : > { %1754 = vst [vmem:[%s2934_s25 + $0xc0] sm:$0xff] %v1722_v44  ;;  %v1615_v58 = vadd.f32 %v4071_v48, %v1614_v38  ;;  %v1657_v23 = vadd.f32 %v4071_v48, %v1656_v12 }
 0x3bd   : > { %v1698_v9 = vadd.f32 %v4073_v31, %v1615_v58  ;;  %v1634_v16 = vpop.f32.mrf.mxu1  ;;  %v1715_v30 = vadd.f32 %v4073_v31, %v1657_v23 }
 0x3be   : > { %v1635_v2 = vadd.f32 %v4071_v48, %v1634_v16  ;;  %v1676_v51 = vpop.f32.mrf.mxu3 }
 0x3bf   : > { %1730 = vst [vmem:[%s2934_s25] sm:$0xff] %v1698_v9  ;;  %v1677_v62 = vadd.f32 %v4071_v48, %v1676_v51 }
 0x3c0   : > { %v1706_v40 = vadd.f32 %v4073_v31, %v1635_v2  ;;  %1747 = vst [vmem:[%s2934_s25 + $0x88] sm:$0xff] %v1715_v30 }
 0x3c1   : > { %v1723_v49 = vadd.f32 %v4073_v31, %v1677_v62 }
 0x3c2   : > { %1738 = vst [vmem:[%s2934_s25 + $0x40] sm:$0xff] %v1706_v40  ;;  %v1616_v41 = vpop.f32.mrf.mxu0 }
 0x3c3   : > { %1755 = vst [vmem:[%s2934_s25 + $0xc8] sm:$0xff] %v1723_v49  ;;  %v1617_v45 = vadd.f32 %v4071_v48, %v1616_v41 }
 0x3c5   : > { %v1699_v21 = vadd.f32 %v4073_v31, %v1617_v45  ;;  %v1636_v61 = vpop.f32.mrf.mxu1 }
 0x3c6   : > { %v1637_v0 = vadd.f32 %v4071_v48, %v1636_v61 }
 0x3c7   : > { %1731 = vst [vmem:[%s2934_s25 + $0x8] sm:$0xff] %v1699_v21 }
 0x3c8   : > { %v1707_v25 = vadd.f32 %v4073_v31, %v1637_v0 }
 0x3ca   : > { %1739 = vst [vmem:[%s2934_s25 + $0x48] sm:$0xff] %v1707_v25 }
 0x3cd   : > { %v1659_v11 = vpop.f32.mrf.mxu2 }
 0x3ce   : > { %v1660_v7 = vadd.f32 %v4071_v48, %v1659_v11  ;;  %v1619_v15 = vpop.f32.mrf.mxu0 }
 0x3cf   : > { %v1620_v35 = vadd.f32 %v4071_v48, %v1619_v15 }
 0x3d0   : > { %v1716_v1 = vadd.f32 %v4073_v31, %v1660_v7 }
 0x3d1   : > { %v1700_v42 = vadd.f32 %v4073_v31, %v1620_v35 }
 0x3d2   : > { %1748 = vst [vmem:[%s2934_s25 + $0x90] sm:$0xff] %v1716_v1 }
 0x3d3   : > { %1732 = vst [vmem:[%s2934_s25 + $0x10] sm:$0xff] %v1700_v42 }
 0x3d5   : > { %v1661_v37 = vpop.f32.mrf.mxu2 }
 0x3d6   : > { %v1662_v28 = vadd.f32 %v4071_v48, %v1661_v37  ;;  %v1621_v26 = vpop.f32.mrf.mxu0 }
 0x3d7   : > { %v1622_v10 = vadd.f32 %v4071_v48, %v1621_v26 }
 0x3d8   : > { %v1717_v36 = vadd.f32 %v4073_v31, %v1662_v28 }
 0x3d9   : > { %v1701_v14 = vadd.f32 %v4073_v31, %v1622_v10 }
 0x3da   : > { %1749 = vst [vmem:[%s2934_s25 + $0x98] sm:$0xff] %v1717_v36 }
 0x3db   : > { %1733 = vst [vmem:[%s2934_s25 + $0x18] sm:$0xff] %v1701_v14 }
 0x3dc   : > { %v1679_v54 = vpop.f32.mrf.mxu3 }
 0x3dd   : > { %v1680_v47 = vadd.f32 %v4071_v48, %v1679_v54 }
 0x3df   : > { %v1724_v20 = vadd.f32 %v4073_v31, %v1680_v47  ;;  %v1639_v3 = vpop.f32.mrf.mxu1 }
 0x3e0   : > { %v1640_v43 = vadd.f32 %v4071_v48, %v1639_v3 }
 0x3e1   : > { %1756 = vst [vmem:[%s2934_s25 + $0xd0] sm:$0xff] %v1724_v20 }
 0x3e2   : > { %v1708_v29 = vadd.f32 %v4073_v31, %v1640_v43 }
 0x3e4   : > { %1740 = vst [vmem:[%s2934_s25 + $0x50] sm:$0xff] %v1708_v29  ;;  %v1681_v32 = vpop.f32.mrf.mxu3 }
 0x3e5   : > { %v1682_v34 = vadd.f32 %v4071_v48, %v1681_v32 }
 0x3e7   : > { %v1725_v13 = vadd.f32 %v4073_v31, %v1682_v34  ;;  %v1641_v60 = vpop.f32.mrf.mxu1 }
 0x3e8   : > { %v1642_v24 = vadd.f32 %v4071_v48, %v1641_v60 }
 0x3e9   : > { %1757 = vst [vmem:[%s2934_s25 + $0xd8] sm:$0xff] %v1725_v13 }
 0x3ea   : > { %v1709_v6 = vadd.f32 %v4073_v31, %v1642_v24 }
 0x3ec   : > { %1741 = vst [vmem:[%s2934_s25 + $0x58] sm:$0xff] %v1709_v6 }
 0x3ee   : > { %v1664_v19 = vpop.f32.mrf.mxu2 }
 0x3ef   : > { %v1665_v27 = vadd.f32 %v4071_v48, %v1664_v19 }
 0x3f1   : > { %v1718_v52 = vadd.f32 %v4073_v31, %v1665_v27 }
 0x3f3   : > { %v1684_v8 = vpop.f32.mrf.mxu3  ;;  %1750 = vst [vmem:[%s2934_s25 + $0xa0] sm:$0xff] %v1718_v52 }
 0x3f4   : > { %v1685_v22 = vadd.f32 %v4071_v48, %v1684_v8 }
 0x3f6   : > { %v1726_v56 = vadd.f32 %v4073_v31, %v1685_v22  ;;  %v1666_v55 = vpop.f32.mrf.mxu2 }
 0x3f7   : > { %v1624_v4 = vpop.f32.mrf.mxu0  ;;  %v1667_v59 = vadd.f32 %v4071_v48, %v1666_v55 }
 0x3f8   : > { %1758 = vst [vmem:[%s2934_s25 + $0xe0] sm:$0xff] %v1726_v56  ;;  %v1625_v39 = vadd.f32 %v4071_v48, %v1624_v4 }
 0x3f9   : > { %v1719_v18 = vadd.f32 %v4073_v31, %v1667_v59 }
 0x3fa   : > { %v1702_v46 = vadd.f32 %v4073_v31, %v1625_v39  ;;  %v1644_v50 = vpop.f32.mrf.mxu1 }
 0x3fb   : > { %v1686_v17 = vpop.f32.mrf.mxu3  ;;  %v1645_v33 = vadd.f32 %v4071_v48, %v1644_v50  ;;  %1751 = vst [vmem:[%s2934_s25 + $0xa8] sm:$0xff] %v1719_v18 }
 0x3fc   : > { %1734 = vst [vmem:[%s2934_s25 + $0x20] sm:$0xff] %v1702_v46  ;;  %v1687_v5 = vadd.f32 %v4071_v48, %v1686_v17 }
 0x3fd   : > { %v1710_v63 = vadd.f32 %v4073_v31, %v1645_v33 }
 0x3fe   : > { %v1727_v53 = vadd.f32 %v4073_v31, %v1687_v5 }
 0x3ff   : > { %v1626_v57 = vpop.f32.mrf.mxu0  ;;  %1742 = vst [vmem:[%s2934_s25 + $0x60] sm:$0xff] %v1710_v63 }
 0x400   : > { %1759 = vst [vmem:[%s2934_s25 + $0xe8] sm:$0xff] %v1727_v53  ;;  %v1627_v44 = vadd.f32 %v4071_v48, %v1626_v57 }
 0x402   : > { %v1703_v38 = vadd.f32 %v4073_v31, %v1627_v44  ;;  %v1646_v12 = vpop.f32.mrf.mxu1 }
 0x403   : > { %v1669_v58 = vpop.f32.mrf.mxu2  ;;  %v1647_v23 = vadd.f32 %v4071_v48, %v1646_v12 }
 0x404   : > { %1735 = vst [vmem:[%s2934_s25 + $0x28] sm:$0xff] %v1703_v38  ;;  %v1670_v9 = vadd.f32 %v4071_v48, %v1669_v58 }
 0x405   : > { %v1711_v16 = vadd.f32 %v4073_v31, %v1647_v23 }
 0x406   : > { %v1720_v30 = vadd.f32 %v4073_v31, %v1670_v9  ;;  %v1689_v2 = vpop.f32.mrf.mxu3 }
 0x407   : > { %1743 = vst [vmem:[%s2934_s25 + $0x68] sm:$0xff] %v1711_v16  ;;  %v1690_v51 = vadd.f32 %v4071_v48, %v1689_v2  ;;  %v1629_v62 = vpop.f32.mrf.mxu0 }
 0x408   : > { %1752 = vst [vmem:[%s2934_s25 + $0xb0] sm:$0xff] %v1720_v30  ;;  %v1630_v40 = vadd.f32 %v4071_v48, %v1629_v62 }
 0x409   : > { %v1728_v49 = vadd.f32 %v4073_v31, %v1690_v51 }
 0x40a   : > { %v1704_v41 = vadd.f32 %v4073_v31, %v1630_v40  ;;  %v1649_v45 = vpop.f32.mrf.mxu1 }
 0x40b   : > { %v1671_v21 = vpop.f32.mrf.mxu2  ;;  %1760 = vst [vmem:[%s2934_s25 + $0xf0] sm:$0xff] %v1728_v49  ;;  %v1650_v61 = vadd.f32 %v4071_v48, %v1649_v45 }
 0x40c   : > { %v1672_v0 = vadd.f32 %v4071_v48, %v1671_v21  ;;  %1736 = vst [vmem:[%s2934_s25 + $0x30] sm:$0xff] %v1704_v41 }
 0x40d   : > { %v1712_v25 = vadd.f32 %v4073_v31, %v1650_v61 }
 0x40e   : > { %v1721_v11 = vadd.f32 %v4073_v31, %v1672_v0  ;;  %v1691_v7 = vpop.f32.mrf.mxu3 }
 0x40f   : > { %1744 = vst [vmem:[%s2934_s25 + $0x70] sm:$0xff] %v1712_v25  ;;  %v1692_v15 = vadd.f32 %v4071_v48, %v1691_v7  ;;  %v1631_v35 = vpop.f32.mrf.mxu0 }
 0x410   : > { %1753 = vst [vmem:[%s2934_s25 + $0xb8] sm:$0xff] %v1721_v11  ;;  %v1632_v1 = vadd.f32 %v4071_v48, %v1631_v35 }
 0x411   : > { %v1729_v42 = vadd.f32 %v4073_v31, %v1692_v15 }
 0x412   : > { %v1705_v37 = vadd.f32 %v4073_v31, %v1632_v1  ;;  %v1651_v28 = vpop.f32.mrf.mxu1 }
 0x413   : > { %1761 = vst [vmem:[%s2934_s25 + $0xf8] sm:$0xff] %v1729_v42  ;;  %v1652_v26 = vadd.f32 %v4071_v48, %v1651_v28 }
 0x414   : > { %1737 = vst [vmem:[%s2934_s25 + $0x38] sm:$0xff] %v1705_v37 }
 0x415   : > { %v1713_v10 = vadd.f32 %v4073_v31, %v1652_v26 }
 0x417   : > { %1745 = vst [vmem:[%s2934_s25 + $0x78] sm:$0xff] %v1713_v10 }
 0x418   : > { %2550 = shalt.err (!%p2547_p10)
}
 0x419   : > { %s2676_s28 = smov 128   ;;  %s2677_s25 = smov 8  }
 0x41a   : > { %2126 = dma.vmem_to_hbm [thread:$0]  (%p2854_p3), %s1778_s24, 4096, %s1780_s29, %s1763_s7, %s2676_s28, %s2676_s28, %s2677_s25  }
 0x41b PF: > { %s4363_s9 = sld [smem:[#allocation21_spill]]  ;;  %p2161_p13 = scmp.ge.s32.totalorder %s2661_s23, 2 }
 0x41d   : > { %p2149_p0 = pnand %p2161_p13, %p2866_p8 }
 0x41f   : > { %p2150_p4 = pneg %p2149_p0 }
 0x421   : > { %s1794_s27 = sand.u32 1, %s4363_s9  }
 0x422   : > { %s1795_s19 = scalar_lea.sflag [#allocation5], %s1794_s27 }
 0x423   : > { %2616 = dma.done.wait (%p2150_p4), %s1795_s19, 4096  }
 0x424   : > { %2618 = vsyncadd (%p2150_p4), %s1795_s19, 4294963200  ;;  %s31_s23 = sadd.s32 1, %s2661_s23   ;;  %s4365_s0 = sld [smem:[#allocation22_spill]] }
 0x425   : > { %p28_p12 = scmp.ge.s32.totalorder %s31_s23, 6   ;;  %s4366_s18 = sld [smem:[#allocation29_spill]] }
 0x426   : > { %s4367_s19 = sld [smem:[#allocation24_spill]]  ;;  %s4370_s13 = smov %s2625_s14 }
 0x427   : > { %s4368_s21 = sld [smem:[#allocation25_spill]]  ;;  %s4371_s14 = smov %s2629_s15 }
 0x428   : > { %s4369_s26 = sld [smem:[#allocation27_spill]]  ;;  %s4372_s15 = smov %s2892_s8 }
 0x429   : > { %s4373_s16 = smov %s2637_s17  ;;  %s4375_s20 = smov %s2657_s22 }
 0x42a   : > { %s4374_s17 = smov %s4365_s0  ;;  %30 = sbr.rel (!%p28_p12) target bundleno = 22 (0x16), region = 138 }
 0x42e   : > { %s4376_s22 = smov %s4369_s26 }
 0x42f   :  { %1801 = vsyncpa [#allocation4], 1 }
 0x430   :  { %1803 = vsyncpa [#allocation4 + $0x1], 1 }
 0x431   :  { %1804 = vsyncpa [#allocation7], 1 }
 0x432   :  { %1806 = vsyncpa [#allocation7 + $0x1], 1 }
 0x433   :  { %1807 = vsyncpa [#allocation10], 1 }
 0x434   :  { %1808 = vsyncpa [#allocation13], 1 }
 0x435   :  { %1809 = vsyncpa [#allocation5], 1 }
 0x436   :  { %1811 = vsyncpa [#allocation5 + $0x1], 1 }

</bundles_post_ra>
